<compile_context>
chip_gen: v7x
topology: tpu7x:2x2x1
jax: 0.10.0
libtpu: 0.0.40
codegen_flags: <defaults>
</compile_context>

<pallas_src>
import math
import functools

import jax
import jax.numpy as jnp
from jax.experimental import pallas as pl
from jax.experimental.pallas import tpu as pltpu


# ----------------------------------------------------------------------------
# helpers
# ----------------------------------------------------------------------------
def _round_up(n, m):
    return ((n + m - 1) // m) * m


def _pad2(a, rows, cols):
    r, c = a.shape
    return jnp.pad(a, ((0, rows - r), (0, cols - c)))


def _mm(a_f32, w_bf16):
    """bf16 x bf16 MXU matmul with f32 accumulation."""
    return jnp.dot(a_f32.astype(jnp.bfloat16), w_bf16,
                   preferred_element_type=jnp.float32)


# ----------------------------------------------------------------------------
# kernel
# ----------------------------------------------------------------------------
def cvae_kernel(
    latent_pad,
    # activations / per-sample biases / noise
    x_ref, cenc_ref, cdec_ref, eps_ref,
    # encoder (bf16 weights, f32 biases)
    w1_ref, w2_ref, b2_ref, w3_ref, b3_ref,
    # fused mu|logvar head
    wmulv_ref, bmulv_ref,
    # decoder
    d1_ref, d2_ref, db2_ref, d3_ref, db3_ref, d4_ref, db4_ref,
    # outputs
    xhat_ref, mu_ref, lv_ref,
):
    # ---- encoder: Linear(cat[x,c]) -> ReLU -> Linear -> ReLU -> Linear -> ReLU
    # cenc_ref already holds (c @ W1_c + b1) per sample.
    h = _mm(x_ref[...], w1_ref[...]) + cenc_ref[...]
    h = jnp.maximum(h, 0.0)
    h = jnp.maximum(_mm(h, w2_ref[...]) + b2_ref[...], 0.0)
    h = jnp.maximum(_mm(h, w3_ref[...]) + b3_ref[...], 0.0)

    # ---- fused posterior heads: one (hidden, 2*latent_pad) matmul
    mulv = _mm(h, wmulv_ref[...]) + bmulv_ref[...]
    mu = mulv[:, :latent_pad]           # static, 128-aligned slices
    lv = mulv[:, latent_pad:]
    mu_ref[...] = mu
    lv_ref[...] = lv

    # ---- reparameterization trick: z = mu + exp(logvar / 2) * eps  (f32)
    z = mu + jnp.exp(lv * 0.5) * eps_ref[...]

    # ---- decoder: Linear(cat[z,c]) -> ReLU -> (Linear -> ReLU) x2
    #      -> Linear -> Sigmoid
    # cdec_ref already holds (c @ D1_c + db1) per sample.
    g = jnp.maximum(_mm(z, d1_ref[...]) + cdec_ref[...], 0.0)
    g = jnp.maximum(_mm(g, d2_ref[...]) + db2_ref[...], 0.0)
    g = jnp.maximum(_mm(g, d3_ref[...]) + db3_ref[...], 0.0)
    logits = _mm(g, d4_ref[...]) + db4_ref[...]
    xhat_ref[...] = jax.nn.sigmoid(logits)


# ----------------------------------------------------------------------------
# params (nn.Linear-style init, weights stored as (in_features, out_features))
# ----------------------------------------------------------------------------
def init_linear(key, fan_in, fan_out):
    kw, kb = jax.random.split(key)
    bound = 1.0 / math.sqrt(fan_in)
    w = jax.random.uniform(kw, (fan_in, fan_out), jnp.float32, -bound, bound)
    b = jax.random.uniform(kb, (1, fan_out), jnp.float32, -bound, bound)
    return w, b


def init_cvae_params(key, input_size, num_classes, latent_size, hidden_dim):
    keys = jax.random.split(key, 9)
    p = {}
    # encoder layer 1 acts on cat([x, c]) -> split weight into x-part / c-part
    w1, b1 = init_linear(keys[0], input_size + num_classes, hidden_dim)
    p["w1x"], p["w1c"], p["b1"] = w1[:input_size], w1[input_size:], b1
    p["w2"], p["b2"] = init_linear(keys[1], hidden_dim, hidden_dim)
    p["w3"], p["b3"] = init_linear(keys[2], hidden_dim, hidden_dim)
    p["wmu"], p["bmu"] = init_linear(keys[3], hidden_dim, latent_size)
    p["wlv"], p["blv"] = init_linear(keys[4], hidden_dim, latent_size)
    # decoder layer 1 acts on cat([z, c]) -> split weight
    d1, db1 = init_linear(keys[5], latent_size + num_classes, hidden_dim)
    p["d1z"], p["d1c"], p["db1"] = d1[:latent_size], d1[latent_size:], db1
    p["d2"], p["db2"] = init_linear(keys[6], hidden_dim, hidden_dim)
    p["d3"], p["db3"] = init_linear(keys[7], hidden_dim, hidden_dim)
    p["d4"], p["db4"] = init_linear(keys[8], hidden_dim, input_size)
    return p


# ----------------------------------------------------------------------------
# wrapper
# ----------------------------------------------------------------------------
@functools.partial(
    jax.jit,
    static_argnames=("input_size", "num_classes", "latent_size", "hidden_dim"))
def cvae_forward(x_nchw, c, eps, params, *, input_size, num_classes,
                 latent_size, hidden_dim):
    """x_nchw: (N,1,H,W) f32; c: (N,num_classes) f32; eps: (N,latent) f32."""
    N = x_nchw.shape[0]
    H, W = x_nchw.shape[2], x_nchw.shape[3]

    IN_P = _round_up(input_size, 128)
    HID_P = _round_up(hidden_dim, 128)
    LAT_P = _round_up(latent_size, 128)

    # batch tiling: sublane-aligned tile, parallel grid over batch tiles.
    TILE_N = 256 if N >= 256 else _round_up(N, 8)
    N_P = _round_up(N, TILE_N)
    grid = (N_P // TILE_N,)

    x_flat = x_nchw.reshape(N, input_size)  # same as torch flatten on NCHW

    # fold one-hot class contributions + first-layer biases into per-sample
    # biases (c is one-hot, so this is effectively a row gather).
    cenc = c @ params["w1c"] + params["b1"]      # (N, hidden)
    cdec = c @ params["d1c"] + params["db1"]     # (N, hidden)

    # ---- pad activations (batch -> N_P rows, features -> 128-multiples)
    x_p = _pad2(x_flat, N_P, IN_P)
    cenc_p = _pad2(cenc, N_P, HID_P)
    cdec_p = _pad2(cdec, N_P, HID_P)
    eps_p = _pad2(eps, N_P, LAT_P)

    # ---- pad weights, cast matmul operands to bf16 (biases stay f32)
    bf = jnp.bfloat16
    w1 = _pad2(params["w1x"], IN_P, HID_P).astype(bf)
    w2 = _pad2(params["w2"], HID_P, HID_P).astype(bf)
    b2 = _pad2(params["b2"], 1, HID_P)
    w3 = _pad2(params["w3"], HID_P, HID_P).astype(bf)
    b3 = _pad2(params["b3"], 1, HID_P)
    wmulv = jnp.concatenate(
        [_pad2(params["wmu"], HID_P, LAT_P),
         _pad2(params["wlv"], HID_P, LAT_P)], axis=1).astype(bf)
    bmulv = jnp.concatenate(
        [_pad2(params["bmu"], 1, LAT_P),
         _pad2(params["blv"], 1, LAT_P)], axis=1)
    d1 = _pad2(params["d1z"], LAT_P, HID_P).astype(bf)
    d2 = _pad2(params["d2"], HID_P, HID_P).astype(bf)
    db2 = _pad2(params["db2"], 1, HID_P)
    d3 = _pad2(params["d3"], HID_P, HID_P).astype(bf)
    db3 = _pad2(params["db3"], 1, HID_P)
    d4 = _pad2(params["d4"], HID_P, IN_P).astype(bf)
    db4 = _pad2(params["db4"], 1, IN_P)

    ordered = [
        x_p, cenc_p, cdec_p, eps_p,
        w1, w2, b2, w3, b3,
        wmulv, bmulv,
        d1, d2, db2, d3, db3, d4, db4,
    ]

    def row_spec(feat):
        return pl.BlockSpec((TILE_N, feat), lambda i: (i, 0))

    def full_spec(a):
        return pl.BlockSpec(a.shape, lambda i: (0, 0))

    in_specs = [
        row_spec(IN_P), row_spec(HID_P), row_spec(HID_P), row_spec(LAT_P),
    ] + [full_spec(a) for a in ordered[4:]]

    out_specs = (row_spec(IN_P), row_spec(LAT_P), row_spec(LAT_P))
    out_shape = (
        jax.ShapeDtypeStruct((N_P, IN_P), jnp.float32),
        jax.ShapeDtypeStruct((N_P, LAT_P), jnp.float32),
        jax.ShapeDtypeStruct((N_P, LAT_P), jnp.float32),
    )

    xhat_p, mu_p, lv_p = pl.pallas_call(
        functools.partial(cvae_kernel, LAT_P),
        grid=grid,
        in_specs=in_specs,
        out_specs=out_specs,
        out_shape=out_shape,
        compiler_params=pltpu.CompilerParams(
            dimension_semantics=("parallel",)),
    )(*ordered)

    x_hat = xhat_p[:N, :input_size].reshape(N, 1, H, W)  # nn.Unflatten
    mu = mu_p[:N, :latent_size]
    logvar = lv_p[:N, :latent_size]
    return x_hat, mu, logvar


# ----------------------------------------------------------------------------
# pure-JAX reference with the same bf16-matmul / f32-accumulate math
# ----------------------------------------------------------------------------
def reference_forward(x_nchw, c, eps, params, input_size):
    N = x_nchw.shape[0]
    x = x_nchw.reshape(N, input_size)

    def mm(a, w):
        return jnp.dot(a.astype(jnp.bfloat16), w.astype(jnp.bfloat16),
                       preferred_element_type=jnp.float32)

    cenc = c @ params["w1c"] + params["b1"]
    cdec = c @ params["d1c"] + params["db1"]
    h = jnp.maximum(mm(x, params["w1x"]) + cenc, 0.0)
    h = jnp.maximum(mm(h, params["w2"]) + params["b2"], 0.0)
    h = jnp.maximum(mm(h, params["w3"]) + params["b3"], 0.0)
    mu = mm(h, params["wmu"]) + params["bmu"]
    lv = mm(h, params["wlv"]) + params["blv"]
    z = mu + jnp.exp(lv / 2.0) * eps
    g = jnp.maximum(mm(z, params["d1z"]) + cdec, 0.0)
    g = jnp.maximum(mm(g, params["d2"]) + params["db2"], 0.0)
    g = jnp.maximum(mm(g, params["d3"]) + params["db3"], 0.0)
    x_hat = jax.nn.sigmoid(mm(g, params["d4"]) + params["db4"])
    return (x_hat.reshape(N, 1, x_nchw.shape[2], x_nchw.shape[3]), mu, lv)


if __name__ == "__main__":
    # Small shapes consistent with the module: x is (N, 1, H, W) with
    # input_size = H*W; c is a one-hot class vector (N, num_classes).
    N = 2
    H = W = 16
    input_size = H * W          # 256
    num_classes = 10
    latent_size = 15
    hidden_dim = 256            # module default

    key = jax.random.PRNGKey(0)
    k_params, k_x, k_c, k_eps = jax.random.split(key, 4)

    params = init_cvae_params(k_params, input_size, num_classes,
                              latent_size, hidden_dim)

    x = jax.random.uniform(k_x, (N, 1, H, W), jnp.float32)
    labels = jax.random.randint(k_c, (N,), 0, num_classes)
    c = jax.nn.one_hot(labels, num_classes, dtype=jnp.float32)
    # TODO(synk): torch.randn_like(mu) is sampled inside the PyTorch module;
    # here the Gaussian epsilon is sampled outside and passed into the kernel.
    eps = jax.random.normal(k_eps, (N, latent_size), jnp.float32)

    x_hat, mu, logvar = cvae_forward(
        x, c, eps, params,
        input_size=input_size, num_classes=num_classes,
        latent_size=latent_size, hidden_dim=hidden_dim)
    jax.block_until_ready((x_hat, mu, logvar))

    # sanity check against a pure-JAX reference using identical precision
    x_hat_r, mu_r, lv_r = reference_forward(x, c, eps, params, input_size)
    assert x_hat.shape == (N, 1, H, W)
    assert mu.shape == (N, latent_size) and logvar.shape == (N, latent_size)
    assert jnp.allclose(x_hat, x_hat_r, atol=2e-3), float(jnp.max(jnp.abs(x_hat - x_hat_r)))
    assert jnp.allclose(mu, mu_r, atol=2e-3), float(jnp.max(jnp.abs(mu - mu_r)))
    assert jnp.allclose(logvar, lv_r, atol=2e-3), float(jnp.max(jnp.abs(logvar - lv_r)))

    print("KERNEL_OK")
</pallas_src>

<mosaic_0001>
module attributes {stable_mosaic.version = 11 : i64} {
  func.func @cvae_kernel(%arg0: i32, %arg1: memref<8x256xf32, #tpu.memory_space<vmem>>, %arg2: memref<8x256xf32, #tpu.memory_space<vmem>>, %arg3: memref<8x256xf32, #tpu.memory_space<vmem>>, %arg4: memref<8x128xf32, #tpu.memory_space<vmem>>, %arg5: memref<256x256xbf16, #tpu.memory_space<vmem>>, %arg6: memref<256x256xbf16, #tpu.memory_space<vmem>>, %arg7: memref<1x256xf32, #tpu.memory_space<vmem>>, %arg8: memref<256x256xbf16, #tpu.memory_space<vmem>>, %arg9: memref<1x256xf32, #tpu.memory_space<vmem>>, %arg10: memref<256x256xbf16, #tpu.memory_space<vmem>>, %arg11: memref<1x256xf32, #tpu.memory_space<vmem>>, %arg12: memref<128x256xbf16, #tpu.memory_space<vmem>>, %arg13: memref<256x256xbf16, #tpu.memory_space<vmem>>, %arg14: memref<1x256xf32, #tpu.memory_space<vmem>>, %arg15: memref<256x256xbf16, #tpu.memory_space<vmem>>, %arg16: memref<1x256xf32, #tpu.memory_space<vmem>>, %arg17: memref<256x256xbf16, #tpu.memory_space<vmem>>, %arg18: memref<1x256xf32, #tpu.memory_space<vmem>>, %arg19: memref<8x256xf32, #tpu.memory_space<vmem>>, %arg20: memref<8x128xf32, #tpu.memory_space<vmem>>, %arg21: memref<8x128xf32, #tpu.memory_space<vmem>>) attributes {dimension_semantics = [#tpu.dimension_semantics<parallel>], iteration_bounds = array<i64: 1>, scalar_prefetch = 0 : i64, scratch_operands = 0 : i64, tpu.core_type = #tpu.core_type<tc>, window_params = [{transform_indices = @transform_0, window_bounds = array<i64: 8, 256>}, {transform_indices = @transform_1, window_bounds = array<i64: 8, 256>}, {transform_indices = @transform_2, window_bounds = array<i64: 8, 256>}, {transform_indices = @transform_3, window_bounds = array<i64: 8, 128>}, {pipeline_mode = #tpu.pipeline_mode<synchronous>, transform_indices = @transform_4, window_bounds = array<i64: 256, 256>}, {pipeline_mode = #tpu.pipeline_mode<synchronous>, transform_indices = @transform_5, window_bounds = array<i64: 256, 256>}, {pipeline_mode = #tpu.pipeline_mode<synchronous>, transform_indices = @transform_6, window_bounds = array<i64: 1, 256>}, {pipeline_mode = #tpu.pipeline_mode<synchronous>, transform_indices = @transform_7, window_bounds = array<i64: 256, 256>}, {pipeline_mode = #tpu.pipeline_mode<synchronous>, transform_indices = @transform_8, window_bounds = array<i64: 1, 256>}, {pipeline_mode = #tpu.pipeline_mode<synchronous>, transform_indices = @transform_9, window_bounds = array<i64: 256, 256>}, {pipeline_mode = #tpu.pipeline_mode<synchronous>, transform_indices = @transform_10, window_bounds = array<i64: 1, 256>}, {pipeline_mode = #tpu.pipeline_mode<synchronous>, transform_indices = @transform_11, window_bounds = array<i64: 128, 256>}, {pipeline_mode = #tpu.pipeline_mode<synchronous>, transform_indices = @transform_12, window_bounds = array<i64: 256, 256>}, {pipeline_mode = #tpu.pipeline_mode<synchronous>, transform_indices = @transform_13, window_bounds = array<i64: 1, 256>}, {pipeline_mode = #tpu.pipeline_mode<synchronous>, transform_indices = @transform_14, window_bounds = array<i64: 256, 256>}, {pipeline_mode = #tpu.pipeline_mode<synchronous>, transform_indices = @transform_15, window_bounds = array<i64: 1, 256>}, {pipeline_mode = #tpu.pipeline_mode<synchronous>, transform_indices = @transform_16, window_bounds = array<i64: 256, 256>}, {pipeline_mode = #tpu.pipeline_mode<synchronous>, transform_indices = @transform_17, window_bounds = array<i64: 1, 256>}, {transform_indices = @transform_18, window_bounds = array<i64: 8, 256>}, {transform_indices = @transform_19, window_bounds = array<i64: 8, 128>}, {transform_indices = @transform_20, window_bounds = array<i64: 8, 128>}]} {
    %c0 = arith.constant 0 : index
    %c0_0 = arith.constant 0 : index
    %0 = vector.load %arg1[%c0, %c0_0] : memref<8x256xf32, #tpu.memory_space<vmem>>, vector<8x256xf32>
    %c0_1 = arith.constant 0 : index
    %c0_2 = arith.constant 0 : index
    %1 = vector.load %arg5[%c0_1, %c0_2] : memref<256x256xbf16, #tpu.memory_space<vmem>>, vector<256x256xbf16>
    %2 = arith.truncf %0 : vector<8x256xf32> to vector<8x256xbf16>
    %cst = arith.constant dense<0.000000e+00> : vector<8x256xf32>
    %3 = tpu.matmul %2, %1, %cst {dimension_numbers = #tpu.dot_dimension_numbers<[1], [0], [0], [1], [0, 0, 1, 1], [], []>} : vector<8x256xbf16>, vector<256x256xbf16>, vector<8x256xf32> -> vector<8x256xf32>
    %c0_3 = arith.constant 0 : index
    %c0_4 = arith.constant 0 : index
    %4 = vector.load %arg2[%c0_3, %c0_4] : memref<8x256xf32, #tpu.memory_space<vmem>>, vector<8x256xf32>
    %5 = arith.addf %3, %4 : vector<8x256xf32>
    %cst_5 = arith.constant 0.000000e+00 : f32
    %6 = vector.broadcast %cst_5 : f32 to vector<8x256xf32>
    %7 = arith.maximumf %5, %6 : vector<8x256xf32>
    %c0_6 = arith.constant 0 : index
    %c0_7 = arith.constant 0 : index
    %8 = vector.load %arg6[%c0_6, %c0_7] : memref<256x256xbf16, #tpu.memory_space<vmem>>, vector<256x256xbf16>
    %9 = arith.truncf %7 : vector<8x256xf32> to vector<8x256xbf16>
    %cst_8 = arith.constant dense<0.000000e+00> : vector<8x256xf32>
    %10 = tpu.matmul %9, %8, %cst_8 {dimension_numbers = #tpu.dot_dimension_numbers<[1], [0], [0], [1], [0, 0, 1, 1], [], []>} : vector<8x256xbf16>, vector<256x256xbf16>, vector<8x256xf32> -> vector<8x256xf32>
    %c0_9 = arith.constant 0 : index
    %c0_10 = arith.constant 0 : index
    %11 = vector.load %arg7[%c0_9, %c0_10] : memref<1x256xf32, #tpu.memory_space<vmem>>, vector<1x256xf32>
    %12 = vector.broadcast %11 : vector<1x256xf32> to vector<8x256xf32>
    %13 = arith.addf %10, %12 : vector<8x256xf32>
    %cst_11 = arith.constant 0.000000e+00 : f32
    %14 = vector.broadcast %cst_11 : f32 to vector<8x256xf32>
    %15 = arith.maximumf %13, %14 : vector<8x256xf32>
    %c0_12 = arith.constant 0 : index
    %c0_13 = arith.constant 0 : index
    %16 = vector.load %arg8[%c0_12, %c0_13] : memref<256x256xbf16, #tpu.memory_space<vmem>>, vector<256x256xbf16>
    %17 = arith.truncf %15 : vector<8x256xf32> to vector<8x256xbf16>
    %cst_14 = arith.constant dense<0.000000e+00> : vector<8x256xf32>
    %18 = tpu.matmul %17, %16, %cst_14 {dimension_numbers = #tpu.dot_dimension_numbers<[1], [0], [0], [1], [0, 0, 1, 1], [], []>} : vector<8x256xbf16>, vector<256x256xbf16>, vector<8x256xf32> -> vector<8x256xf32>
    %c0_15 = arith.constant 0 : index
    %c0_16 = arith.constant 0 : index
    %19 = vector.load %arg9[%c0_15, %c0_16] : memref<1x256xf32, #tpu.memory_space<vmem>>, vector<1x256xf32>
    %20 = vector.broadcast %19 : vector<1x256xf32> to vector<8x256xf32>
    %21 = arith.addf %18, %20 : vector<8x256xf32>
    %cst_17 = arith.constant 0.000000e+00 : f32
    %22 = vector.broadcast %cst_17 : f32 to vector<8x256xf32>
    %23 = arith.maximumf %21, %22 : vector<8x256xf32>
    %c0_18 = arith.constant 0 : index
    %c0_19 = arith.constant 0 : index
    %24 = vector.load %arg10[%c0_18, %c0_19] : memref<256x256xbf16, #tpu.memory_space<vmem>>, vector<256x256xbf16>
    %25 = arith.truncf %23 : vector<8x256xf32> to vector<8x256xbf16>
    %cst_20 = arith.constant dense<0.000000e+00> : vector<8x256xf32>
    %26 = tpu.matmul %25, %24, %cst_20 {dimension_numbers = #tpu.dot_dimension_numbers<[1], [0], [0], [1], [0, 0, 1, 1], [], []>} : vector<8x256xbf16>, vector<256x256xbf16>, vector<8x256xf32> -> vector<8x256xf32>
    %c0_21 = arith.constant 0 : index
    %c0_22 = arith.constant 0 : index
    %27 = vector.load %arg11[%c0_21, %c0_22] : memref<1x256xf32, #tpu.memory_space<vmem>>, vector<1x256xf32>
    %28 = vector.broadcast %27 : vector<1x256xf32> to vector<8x256xf32>
    %29 = arith.addf %26, %28 : vector<8x256xf32>
    %30 = vector.extract_strided_slice %29 {offsets = [0, 0], sizes = [8, 128], strides = [1, 1]} : vector<8x256xf32> to vector<8x128xf32>
    %31 = vector.extract_strided_slice %29 {offsets = [0, 128], sizes = [8, 128], strides = [1, 1]} : vector<8x256xf32> to vector<8x128xf32>
    %c0_23 = arith.constant 0 : index
    %c0_24 = arith.constant 0 : index
    %32 = vector.load %arg20[%c0_23, %c0_24] : memref<8x128xf32, #tpu.memory_space<vmem>>, vector<8x128xf32>
    tpu.vector_store %arg20[%c0_23, %c0_24], %30 {strides = array<i32>} : memref<8x128xf32, #tpu.memory_space<vmem>>, vector<8x128xf32>,
    %c0_25 = arith.constant 0 : index
    %c0_26 = arith.constant 0 : index
    %33 = vector.load %arg21[%c0_25, %c0_26] : memref<8x128xf32, #tpu.memory_space<vmem>>, vector<8x128xf32>
    tpu.vector_store %arg21[%c0_25, %c0_26], %31 {strides = array<i32>} : memref<8x128xf32, #tpu.memory_space<vmem>>, vector<8x128xf32>,
    %cst_27 = arith.constant 5.000000e-01 : f32
    %34 = vector.broadcast %cst_27 : f32 to vector<8x128xf32>
    %35 = arith.mulf %31, %34 : vector<8x128xf32>
    %36 = math.exp %35 : vector<8x128xf32>
    %c0_28 = arith.constant 0 : index
    %c0_29 = arith.constant 0 : index
    %37 = vector.load %arg4[%c0_28, %c0_29] : memref<8x128xf32, #tpu.memory_space<vmem>>, vector<8x128xf32>
    %38 = arith.mulf %36, %37 : vector<8x128xf32>
    %39 = arith.addf %30, %38 : vector<8x128xf32>
    %c0_30 = arith.constant 0 : index
    %c0_31 = arith.constant 0 : index
    %40 = vector.load %arg12[%c0_30, %c0_31] : memref<128x256xbf16, #tpu.memory_space<vmem>>, vector<128x256xbf16>
    %41 = arith.truncf %39 : vector<8x128xf32> to vector<8x128xbf16>
    %cst_32 = arith.constant dense<0.000000e+00> : vector<8x256xf32>
    %42 = tpu.matmul %41, %40, %cst_32 {dimension_numbers = #tpu.dot_dimension_numbers<[1], [0], [0], [1], [0, 0, 1, 1], [], []>} : vector<8x128xbf16>, vector<128x256xbf16>, vector<8x256xf32> -> vector<8x256xf32>
    %c0_33 = arith.constant 0 : index
    %c0_34 = arith.constant 0 : index
    %43 = vector.load %arg3[%c0_33, %c0_34] : memref<8x256xf32, #tpu.memory_space<vmem>>, vector<8x256xf32>
    %44 = arith.addf %42, %43 : vector<8x256xf32>
    %cst_35 = arith.constant 0.000000e+00 : f32
    %45 = vector.broadcast %cst_35 : f32 to vector<8x256xf32>
    %46 = arith.maximumf %44, %45 : vector<8x256xf32>
    %c0_36 = arith.constant 0 : index
    %c0_37 = arith.constant 0 : index
    %47 = vector.load %arg13[%c0_36, %c0_37] : memref<256x256xbf16, #tpu.memory_space<vmem>>, vector<256x256xbf16>
    %48 = arith.truncf %46 : vector<8x256xf32> to vector<8x256xbf16>
    %cst_38 = arith.constant dense<0.000000e+00> : vector<8x256xf32>
    %49 = tpu.matmul %48, %47, %cst_38 {dimension_numbers = #tpu.dot_dimension_numbers<[1], [0], [0], [1], [0, 0, 1, 1], [], []>} : vector<8x256xbf16>, vector<256x256xbf16>, vector<8x256xf32> -> vector<8x256xf32>
    %c0_39 = arith.constant 0 : index
    %c0_40 = arith.constant 0 : index
    %50 = vector.load %arg14[%c0_39, %c0_40] : memref<1x256xf32, #tpu.memory_space<vmem>>, vector<1x256xf32>
    %51 = vector.broadcast %50 : vector<1x256xf32> to vector<8x256xf32>
    %52 = arith.addf %49, %51 : vector<8x256xf32>
    %cst_41 = arith.constant 0.000000e+00 : f32
    %53 = vector.broadcast %cst_41 : f32 to vector<8x256xf32>
    %54 = arith.maximumf %52, %53 : vector<8x256xf32>
    %c0_42 = arith.constant 0 : index
    %c0_43 = arith.constant 0 : index
    %55 = vector.load %arg15[%c0_42, %c0_43] : memref<256x256xbf16, #tpu.memory_space<vmem>>, vector<256x256xbf16>
    %56 = arith.truncf %54 : vector<8x256xf32> to vector<8x256xbf16>
    %cst_44 = arith.constant dense<0.000000e+00> : vector<8x256xf32>
    %57 = tpu.matmul %56, %55, %cst_44 {dimension_numbers = #tpu.dot_dimension_numbers<[1], [0], [0], [1], [0, 0, 1, 1], [], []>} : vector<8x256xbf16>, vector<256x256xbf16>, vector<8x256xf32> -> vector<8x256xf32>
    %c0_45 = arith.constant 0 : index
    %c0_46 = arith.constant 0 : index
    %58 = vector.load %arg16[%c0_45, %c0_46] : memref<1x256xf32, #tpu.memory_space<vmem>>, vector<1x256xf32>
    %59 = vector.broadcast %58 : vector<1x256xf32> to vector<8x256xf32>
    %60 = arith.addf %57, %59 : vector<8x256xf32>
    %cst_47 = arith.constant 0.000000e+00 : f32
    %61 = vector.broadcast %cst_47 : f32 to vector<8x256xf32>
    %62 = arith.maximumf %60, %61 : vector<8x256xf32>
    %c0_48 = arith.constant 0 : index
    %c0_49 = arith.constant 0 : index
    %63 = vector.load %arg17[%c0_48, %c0_49] : memref<256x256xbf16, #tpu.memory_space<vmem>>, vector<256x256xbf16>
    %64 = arith.truncf %62 : vector<8x256xf32> to vector<8x256xbf16>
    %cst_50 = arith.constant dense<0.000000e+00> : vector<8x256xf32>
    %65 = tpu.matmul %64, %63, %cst_50 {dimension_numbers = #tpu.dot_dimension_numbers<[1], [0], [0], [1], [0, 0, 1, 1], [], []>} : vector<8x256xbf16>, vector<256x256xbf16>, vector<8x256xf32> -> vector<8x256xf32>
    %c0_51 = arith.constant 0 : index
    %c0_52 = arith.constant 0 : index
    %66 = vector.load %arg18[%c0_51, %c0_52] : memref<1x256xf32, #tpu.memory_space<vmem>>, vector<1x256xf32>
    %67 = vector.broadcast %66 : vector<1x256xf32> to vector<8x256xf32>
    %68 = arith.addf %65, %67 : vector<8x256xf32>
    %69 = arith.negf %68 : vector<8x256xf32>
    %70 = math.exp %69 : vector<8x256xf32>
    %cst_53 = arith.constant 1.000000e+00 : f32
    %71 = vector.broadcast %cst_53 : f32 to vector<8x256xf32>
    %72 = arith.addf %71, %70 : vector<8x256xf32>
    %73 = arith.divf %71, %72 : vector<8x256xf32>
    %c0_54 = arith.constant 0 : index
    %c0_55 = arith.constant 0 : index
    %74 = vector.load %arg19[%c0_54, %c0_55] : memref<8x256xf32, #tpu.memory_space<vmem>>, vector<8x256xf32>
    tpu.vector_store %arg19[%c0_54, %c0_55], %73 {strides = array<i32>} : memref<8x256xf32, #tpu.memory_space<vmem>>, vector<8x256xf32>,
    return
  }
  func.func @transform_0(%arg0: i32) -> (i32, i32) {
    %c0_i32 = arith.constant 0 : i32
    %c0_i32_0 = arith.constant 0 : i32
    return %arg0, %c0_i32 : i32, i32
  }
  func.func @transform_1(%arg0: i32) -> (i32, i32) {
    %c0_i32 = arith.constant 0 : i32
    %c0_i32_0 = arith.constant 0 : i32
    return %arg0, %c0_i32 : i32, i32
  }
  func.func @transform_2(%arg0: i32) -> (i32, i32) {
    %c0_i32 = arith.constant 0 : i32
    %c0_i32_0 = arith.constant 0 : i32
    return %arg0, %c0_i32 : i32, i32
  }
  func.func @transform_3(%arg0: i32) -> (i32, i32) {
    %c0_i32 = arith.constant 0 : i32
    %c0_i32_0 = arith.constant 0 : i32
    return %arg0, %c0_i32 : i32, i32
  }
  func.func @transform_4(%arg0: i32) -> (i32, i32) {
    %c0_i32 = arith.constant 0 : i32
    %c0_i32_0 = arith.constant 0 : i32
    %c0_i32_1 = arith.constant 0 : i32
    return %c0_i32, %c0_i32_0 : i32, i32
  }
  func.func @transform_5(%arg0: i32) -> (i32, i32) {
    %c0_i32 = arith.constant 0 : i32
    %c0_i32_0 = arith.constant 0 : i32
    %c0_i32_1 = arith.constant 0 : i32
    return %c0_i32, %c0_i32_0 : i32, i32
  }
  func.func @transform_6(%arg0: i32) -> (i32, i32) {
    %c0_i32 = arith.constant 0 : i32
    %c0_i32_0 = arith.constant 0 : i32
    %c0_i32_1 = arith.constant 0 : i32
    return %c0_i32, %c0_i32_0 : i32, i32
  }
  func.func @transform_7(%arg0: i32) -> (i32, i32) {
    %c0_i32 = arith.constant 0 : i32
    %c0_i32_0 = arith.constant 0 : i32
    %c0_i32_1 = arith.constant 0 : i32
    return %c0_i32, %c0_i32_0 : i32, i32
  }
  func.func @transform_8(%arg0: i32) -> (i32, i32) {
    %c0_i32 = arith.constant 0 : i32
    %c0_i32_0 = arith.constant 0 : i32
    %c0_i32_1 = arith.constant 0 : i32
    return %c0_i32, %c0_i32_0 : i32, i32
  }
  func.func @transform_9(%arg0: i32) -> (i32, i32) {
    %c0_i32 = arith.constant 0 : i32
    %c0_i32_0 = arith.constant 0 : i32
    %c0_i32_1 = arith.constant 0 : i32
    return %c0_i32, %c0_i32_0 : i32, i32
  }
  func.func @transform_10(%arg0: i32) -> (i32, i32) {
    %c0_i32 = arith.constant 0 : i32
    %c0_i32_0 = arith.constant 0 : i32
    %c0_i32_1 = arith.constant 0 : i32
    return %c0_i32, %c0_i32_0 : i32, i32
  }
  func.func @transform_11(%arg0: i32) -> (i32, i32) {
    %c0_i32 = arith.constant 0 : i32
    %c0_i32_0 = arith.constant 0 : i32
    %c0_i32_1 = arith.constant 0 : i32
    return %c0_i32, %c0_i32_0 : i32, i32
  }
  func.func @transform_12(%arg0: i32) -> (i32, i32) {
    %c0_i32 = arith.constant 0 : i32
    %c0_i32_0 = arith.constant 0 : i32
    %c0_i32_1 = arith.constant 0 : i32
    return %c0_i32, %c0_i32_0 : i32, i32
  }
  func.func @transform_13(%arg0: i32) -> (i32, i32) {
    %c0_i32 = arith.constant 0 : i32
    %c0_i32_0 = arith.constant 0 : i32
    %c0_i32_1 = arith.constant 0 : i32
    return %c0_i32, %c0_i32_0 : i32, i32
  }
  func.func @transform_14(%arg0: i32) -> (i32, i32) {
    %c0_i32 = arith.constant 0 : i32
    %c0_i32_0 = arith.constant 0 : i32
    %c0_i32_1 = arith.constant 0 : i32
    return %c0_i32, %c0_i32_0 : i32, i32
  }
  func.func @transform_15(%arg0: i32) -> (i32, i32) {
    %c0_i32 = arith.constant 0 : i32
    %c0_i32_0 = arith.constant 0 : i32
    %c0_i32_1 = arith.constant 0 : i32
    return %c0_i32, %c0_i32_0 : i32, i32
  }
  func.func @transform_16(%arg0: i32) -> (i32, i32) {
    %c0_i32 = arith.constant 0 : i32
    %c0_i32_0 = arith.constant 0 : i32
    %c0_i32_1 = arith.constant 0 : i32
    return %c0_i32, %c0_i32_0 : i32, i32
  }
  func.func @transform_17(%arg0: i32) -> (i32, i32) {
    %c0_i32 = arith.constant 0 : i32
    %c0_i32_0 = arith.constant 0 : i32
    %c0_i32_1 = arith.constant 0 : i32
    return %c0_i32, %c0_i32_0 : i32, i32
  }
  func.func @transform_18(%arg0: i32) -> (i32, i32) {
    %c0_i32 = arith.constant 0 : i32
    %c0_i32_0 = arith.constant 0 : i32
    return %arg0, %c0_i32 : i32, i32
  }
  func.func @transform_19(%arg0: i32) -> (i32, i32) {
    %c0_i32 = arith.constant 0 : i32
    %c0_i32_0 = arith.constant 0 : i32
    return %arg0, %c0_i32 : i32, i32
  }
  func.func @transform_20(%arg0: i32) -> (i32, i32) {
    %c0_i32 = arith.constant 0 : i32
    %c0_i32_0 = arith.constant 0 : i32
    return %arg0, %c0_i32 : i32, i32
  }
}

</mosaic_0001>

<bundles_post_ra>
// kernel: cvae_forward.1
= control target key start
LH: loop header
LB: loop body
LE: loop exit
PB: predicated region body
PF: predicated region fallthrough
CT: control target
= control target key end

     0   :  { %s3476_s4 = inlined_call_operand.vmem [shape: bf16[256,256], index: 4, kind: input, shape index: {}]   ;;  %s3477_s0 = inlined_call_operand.vmem [shape: f32[8,256], index: 0, kind: input, shape index: {}]   ;;  %s3478_s5 = inlined_call_operand.vmem [shape: bf16[256,256], index: 5, kind: input, shape index: {}]   ;;  %s3479_s7 = inlined_call_operand.vmem [shape: bf16[256,256], index: 7, kind: input, shape index: {}]   ;;  %s3480_s1 = inlined_call_operand.vmem [shape: f32[8,256], index: 1, kind: input, shape index: {}]   ;;  %s3481_s9 = inlined_call_operand.vmem [shape: bf16[256,256], index: 9, kind: input, shape index: {}]   ;;  %s3482_s6 = inlined_call_operand.vmem [shape: f32[1,256], index: 6, kind: input, shape index: {}]   ;;  %s3483_s11 = inlined_call_operand.vmem [shape: bf16[128,256], index: 11, kind: input, shape index: {}]   ;;  %s3484_s8 = inlined_call_operand.vmem [shape: f32[1,256], index: 8, kind: input, shape index: {}]   ;;  %s3485_s12 = inlined_call_operand.vmem [shape: bf16[256,256], index: 12, kind: input, shape index: {}]   ;;  %s3486_s10 = inlined_call_operand.vmem [shape: f32[1,256], index: 10, kind: input, shape index: {}]   ;;  %s3487_s19 = inlined_call_operand.vmem [shape: f32[8,128], index: 19, kind: output, shape index: {1}]   ;;  %s3488_s20 = inlined_call_operand.vmem [shape: f32[8,128], index: 20, kind: output, shape index: {2}]   ;;  %s3489_s3 = inlined_call_operand.vmem [shape: f32[8,128], index: 3, kind: input, shape index: {}]   ;;  %s3490_s14 = inlined_call_operand.vmem [shape: bf16[256,256], index: 14, kind: input, shape index: {}]   ;;  %s3491_s2 = inlined_call_operand.vmem [shape: f32[8,256], index: 2, kind: input, shape index: {}]   ;;  %s3492_s16 = inlined_call_operand.vmem [shape: bf16[256,256], index: 16, kind: input, shape index: {}]   ;;  %s3493_s13 = inlined_call_operand.vmem [shape: f32[1,256], index: 13, kind: input, shape index: {}]   ;;  %s3494_s15 = inlined_call_operand.vmem [shape: f32[1,256], index: 15, kind: input, shape index: {}]   ;;  %s3495_s17 = inlined_call_operand.vmem [shape: f32[1,256], index: 17, kind: input, shape index: {}]   ;;  %s3496_s18 = inlined_call_operand.vmem [shape: f32[8,256], index: 18, kind: output, shape index: {0}]  }
   0x1   :  { %3502 = sst [smem:[#allocation2_spill]] %s3476_s4 }
   0x2   :  { %3503 = sst [smem:[#allocation3_spill]] %s3477_s0  ;;  %s3507_s23 = sld [smem:[#allocation2_spill]] }
   0x3   :  { %3504 = sst [smem:[#allocation4_spill]] %s3478_s5  ;;  %s3508_s24 = sld [smem:[#allocation3_spill]] }
   0x4   :  { %3505 = sst [smem:[#allocation5_spill]] %s3479_s7  ;;  %s3509_s7 = sld [smem:[#allocation4_spill]] }
   0x5   :  { %3506 = sst [smem:[#allocation6_spill]] %s3480_s1  ;;  %s3510_s28 = sld [smem:[#allocation5_spill]] }
   0x6   :  { %s3511_s1 = sld [smem:[#allocation6_spill]] }
   0x8   :  { %v2213_v0 = vld [vmem:[%s3507_s23 + $0x4] ss:$8 sps:$4 sm:$0xff]   ;;  %v2215_v1 = vld [vmem:[%s3507_s23] ss:$8 sps:$4 sm:$0xff]   ;;  %v2216_v2 = vld [vmem:[%s3507_s23 + $0x14] ss:$8 sps:$4 sm:$0xff]  }
   0x9   :  { %261 = vmatprep.subr.bf16.mxu0 %v2213_v0  ;;  %v2218_v3 = vld [vmem:[%s3507_s23 + $0x10] ss:$8 sps:$4 sm:$0xff]   ;;  %v2219_v4 = vld [vmem:[%s3507_s23 + $0x24] ss:$8 sps:$4 sm:$0xff]   ;;  %v2221_v5 = vld [vmem:[%s3507_s23 + $0x20] ss:$8 sps:$4 sm:$0xff]  }
   0xa   :  { %262 = vmatpush1.bf16.msra.mxu0 %v2215_v1  ;;  %v2222_v6 = vld [vmem:[%s3507_s23 + $0x34] ss:$8 sps:$4 sm:$0xff]   ;;  %v2224_v7 = vld [vmem:[%s3507_s23 + $0x30] ss:$8 sps:$4 sm:$0xff]   ;;  %v2225_v8 = vld [vmem:[%s3507_s23 + $0x44] ss:$8 sps:$4 sm:$0xff]  }
   0xb   :  { %263 = vmatprep.subr.bf16.mxu0 %v2216_v2  ;;  %v2227_v9 = vld [vmem:[%s3507_s23 + $0x40] ss:$8 sps:$4 sm:$0xff]   ;;  %v2228_v10 = vld [vmem:[%s3507_s23 + $0x54] ss:$8 sps:$4 sm:$0xff]   ;;  %v2230_v11 = vld [vmem:[%s3507_s23 + $0x50] ss:$8 sps:$4 sm:$0xff]  }
   0xc   :  { %v2231_v12 = vld [vmem:[%s3507_s23 + $0x64] ss:$8 sps:$4 sm:$0xff]   ;;  %v2233_v13 = vld [vmem:[%s3507_s23 + $0x60] ss:$8 sps:$4 sm:$0xff]   ;;  %v2234_v18 = vld [vmem:[%s3507_s23 + $0x74] ss:$8 sps:$4 sm:$0xff]  }
   0xd   :  { %v64_v14 = vld [vmem:[%s3508_s24 + $0x8] sm:$0xff]  ;;  %v2264_v19 = vld [vmem:[%s3509_s7 + $0x14] ss:$8 sps:$4 sm:$0xff]   ;;  %v2236_v20 = vld [vmem:[%s3507_s23 + $0x70] ss:$8 sps:$4 sm:$0xff]  }
   0xe   :  { %264 = vmatpush1.bf16.msra.mxu0 %v2218_v3  ;;  %v98_v15 = vpack.c.bf16 %v64_v14, %v64_v14  ;;  %v2261_v16 = vld [vmem:[%s3509_s7 + $0x4] ss:$8 sps:$4 sm:$0xff]   ;;  %v2263_v17 = vld [vmem:[%s3509_s7] ss:$8 sps:$4 sm:$0xff]   ;;  %v2266_v21 = vld [vmem:[%s3509_s7 + $0x10] ss:$8 sps:$4 sm:$0xff]  }
   0xf   :  { %265 = vmatprep.subr.bf16.mxu0 %v2219_v4  ;;  %510 = vmatprep.subr.bf16.mxu1 %v2261_v16  ;;  %v2267_v22 = vld [vmem:[%s3509_s7 + $0x24] ss:$8 sps:$4 sm:$0xff]   ;;  %v2239_v24 = vld [vmem:[%s3507_s23 + $0x80] ss:$8 sps:$4 sm:$0xff]   ;;  %v2270_v26 = vld [vmem:[%s3509_s7 + $0x34] ss:$8 sps:$4 sm:$0xff]  }
  0x10   :  { %293 = vmatprep.mubr.bf16.mxu0 %v98_v15  ;;  %511 = vmatpush1.bf16.msra.mxu1 %v2263_v17  ;;  %v2237_v23 = vld [vmem:[%s3507_s23 + $0x84] ss:$8 sps:$4 sm:$0xff]   ;;  %v2269_v25 = vld [vmem:[%s3509_s7 + $0x20] ss:$8 sps:$4 sm:$0xff]   ;;  %v2240_v27 = vld [vmem:[%s3507_s23 + $0x94] ss:$8 sps:$4 sm:$0xff]  }
  0x11   :  { %512 = vmatprep.subr.bf16.mxu1 %v2264_v19  ;;  %v2242_v28 = vld [vmem:[%s3507_s23 + $0x90] ss:$8 sps:$4 sm:$0xff]   ;;  %v2273_v30 = vld [vmem:[%s3509_s7 + $0x44] ss:$8 sps:$4 sm:$0xff]   ;;  %v2245_v32 = vld [vmem:[%s3507_s23 + $0xa0] ss:$8 sps:$4 sm:$0xff]  }
  0x12   :  { %266 = vmatpush1.bf16.msra.mxu0 %v2221_v5  ;;  %v2272_v29 = vld [vmem:[%s3509_s7 + $0x30] ss:$8 sps:$4 sm:$0xff]   ;;  %v2243_v31 = vld [vmem:[%s3507_s23 + $0xa4] ss:$8 sps:$4 sm:$0xff]   ;;  %v2275_v33 = vld [vmem:[%s3509_s7 + $0x40] ss:$8 sps:$4 sm:$0xff]  }
  0x13   :  { %267 = vmatprep.subr.bf16.mxu0 %v2222_v6  ;;  %v2276_v34 = vld [vmem:[%s3509_s7 + $0x54] ss:$8 sps:$4 sm:$0xff]   ;;  %v2278_v36 = vld [vmem:[%s3509_s7 + $0x50] ss:$8 sps:$4 sm:$0xff]   ;;  %v2279_v38 = vld [vmem:[%s3509_s7 + $0x64] ss:$8 sps:$4 sm:$0xff]  }
  0x14   :  { %513 = vmatpush1.bf16.msra.mxu1 %v2266_v21  ;;  %v2246_v35 = vld [vmem:[%s3507_s23 + $0xb4] ss:$8 sps:$4 sm:$0xff]   ;;  %v2248_v37 = vld [vmem:[%s3507_s23 + $0xb0] ss:$8 sps:$4 sm:$0xff]   ;;  %v2249_v39 = vld [vmem:[%s3507_s23 + $0xc4] ss:$8 sps:$4 sm:$0xff]  }
  0x15   :  { %514 = vmatprep.subr.bf16.mxu1 %v2267_v22  ;;  %v2281_v40 = vld [vmem:[%s3509_s7 + $0x60] ss:$8 sps:$4 sm:$0xff]   ;;  %v2282_v42 = vld [vmem:[%s3509_s7 + $0x74] ss:$8 sps:$4 sm:$0xff]   ;;  %v2284_v44 = vld [vmem:[%s3509_s7 + $0x70] ss:$8 sps:$4 sm:$0xff]  }
  0x16   :  { %268 = vmatpush1.bf16.msra.mxu0 %v2224_v7  ;;  %v2251_v41 = vld [vmem:[%s3507_s23 + $0xc0] ss:$8 sps:$4 sm:$0xff]   ;;  %v2252_v43 = vld [vmem:[%s3507_s23 + $0xd4] ss:$8 sps:$4 sm:$0xff]   ;;  %v2254_v45 = vld [vmem:[%s3507_s23 + $0xd0] ss:$8 sps:$4 sm:$0xff]  }
  0x17   :  { %269 = vmatprep.subr.bf16.mxu0 %v2225_v8  ;;  %v2285_v46 = vld [vmem:[%s3509_s7 + $0x84] ss:$8 sps:$4 sm:$0xff]   ;;  %v2287_v48 = vld [vmem:[%s3509_s7 + $0x80] ss:$8 sps:$4 sm:$0xff]   ;;  %v2288_v50 = vld [vmem:[%s3509_s7 + $0x94] ss:$8 sps:$4 sm:$0xff]  }
  0x18   :  { %515 = vmatpush1.bf16.msra.mxu1 %v2269_v25  ;;  %v2255_v47 = vld [vmem:[%s3507_s23 + $0xe4] ss:$8 sps:$4 sm:$0xff]   ;;  %v2257_v49 = vld [vmem:[%s3507_s23 + $0xe0] ss:$8 sps:$4 sm:$0xff]   ;;  %v2258_v51 = vld [vmem:[%s3507_s23 + $0xf4] ss:$8 sps:$4 sm:$0xff]  }
  0x19   :  { %516 = vmatprep.subr.bf16.mxu1 %v2270_v26  ;;  %v2290_v52 = vld [vmem:[%s3509_s7 + $0x90] ss:$8 sps:$4 sm:$0xff]   ;;  %v63_v54 = vld [vmem:[%s3508_s24] sm:$0xff]  ;;  %v2294_v58 = vld [vmem:[%s3509_s7 + $0xb4] ss:$8 sps:$4 sm:$0xff]  }
  0x1a   :  { %270 = vmatpush1.bf16.msra.mxu0 %v2227_v9  ;;  %v2260_v53 = vld [vmem:[%s3507_s23 + $0xf0] ss:$8 sps:$4 sm:$0xff]   ;;  %v2291_v55 = vld [vmem:[%s3509_s7 + $0xa4] ss:$8 sps:$4 sm:$0xff]   ;;  %v97_v56 = vpack.c.bf16 %v63_v54, %v63_v54  ;;  %v2293_v57 = vld [vmem:[%s3509_s7 + $0xa0] ss:$8 sps:$4 sm:$0xff]  }
  0x1b   :  { %271 = vmatprep.subr.bf16.mxu0 %v2228_v10  ;;  %v2296_v59 = vld [vmem:[%s3509_s7 + $0xb0] ss:$8 sps:$4 sm:$0xff]   ;;  %v2297_v60 = vld [vmem:[%s3509_s7 + $0xc4] ss:$8 sps:$4 sm:$0xff]   ;;  %v2299_v61 = vld [vmem:[%s3509_s7 + $0xc0] ss:$8 sps:$4 sm:$0xff]  }
  0x1c   :  { %517 = vmatpush1.bf16.msra.mxu1 %v2272_v29  ;;  %v2300_v62 = vld [vmem:[%s3509_s7 + $0xd4] ss:$8 sps:$4 sm:$0xff]   ;;  %v2302_v63 = vld [vmem:[%s3509_s7 + $0xd0] ss:$8 sps:$4 sm:$0xff]   ;;  %v2303_v0 = vld [vmem:[%s3509_s7 + $0xe4] ss:$8 sps:$4 sm:$0xff]  }
  0x1d   :  { %518 = vmatprep.subr.bf16.mxu1 %v2273_v30  ;;  %v2305_v1 = vld [vmem:[%s3509_s7 + $0xe0] ss:$8 sps:$4 sm:$0xff]   ;;  %v2306_v2 = vld [vmem:[%s3509_s7 + $0xf4] ss:$8 sps:$4 sm:$0xff]   ;;  %v2308_v3 = vld [vmem:[%s3509_s7 + $0xf0] ss:$8 sps:$4 sm:$0xff]  }
  0x1e   :  { %272 = vmatpush1.bf16.msra.mxu0 %v2230_v11  ;;  %v2309_v4 = vld [vmem:[%s3510_s28] ss:$8 sps:$4 sm:$0xff]   ;;  %v2311_v5 = vld [vmem:[%s3510_s28 + $0x4] ss:$8 sps:$4 sm:$0xff]   ;;  %v2314_v6 = vld [vmem:[%s3510_s28 + $0x14] ss:$8 sps:$4 sm:$0xff]  }
  0x1f   :  { %273 = vmatprep.subr.bf16.mxu0 %v2231_v12  ;;  %v2312_v7 = vld [vmem:[%s3510_s28 + $0x10] ss:$8 sps:$4 sm:$0xff]   ;;  %v2317_v8 = vld [vmem:[%s3510_s28 + $0x24] ss:$8 sps:$4 sm:$0xff]   ;;  %v2315_v9 = vld [vmem:[%s3510_s28 + $0x20] ss:$8 sps:$4 sm:$0xff]  }
  0x20   :  { %519 = vmatpush1.bf16.msra.mxu1 %v2275_v33  ;;  %v2320_v10 = vld [vmem:[%s3510_s28 + $0x34] ss:$8 sps:$4 sm:$0xff]   ;;  %v2318_v11 = vld [vmem:[%s3510_s28 + $0x30] ss:$8 sps:$4 sm:$0xff]   ;;  %v2323_v12 = vld [vmem:[%s3510_s28 + $0x44] ss:$8 sps:$4 sm:$0xff]  }
  0x21   :  { %520 = vmatprep.subr.bf16.mxu1 %v2276_v34  ;;  %v2326_v14 = vld [vmem:[%s3510_s28 + $0x54] ss:$8 sps:$4 sm:$0xff]   ;;  %v2324_v15 = vld [vmem:[%s3510_s28 + $0x50] ss:$8 sps:$4 sm:$0xff]   ;;  %v2329_v16 = vld [vmem:[%s3510_s28 + $0x64] ss:$8 sps:$4 sm:$0xff]  }
  0x22   :  { %274 = vmatpush1.bf16.msra.mxu0 %v2233_v13  ;;  %v2321_v13 = vld [vmem:[%s3510_s28 + $0x40] ss:$8 sps:$4 sm:$0xff]   ;;  %v2330_v19 = vld [vmem:[%s3510_s28 + $0x70] ss:$8 sps:$4 sm:$0xff]   ;;  %v2338_v22 = vld [vmem:[%s3510_s28 + $0x94] ss:$8 sps:$4 sm:$0xff]  }
  0x23   :  { %275 = vmatprep.subr.bf16.mxu0 %v2234_v18  ;;  %v2327_v17 = vld [vmem:[%s3510_s28 + $0x60] ss:$8 sps:$4 sm:$0xff]   ;;  %v2332_v18 = vld [vmem:[%s3510_s28 + $0x74] ss:$8 sps:$4 sm:$0xff]  }
  0x24   :  { %521 = vmatpush1.bf16.msra.mxu1 %v2278_v36  ;;  %v2333_v21 = vld [vmem:[%s3510_s28 + $0x80] ss:$8 sps:$4 sm:$0xff]   ;;  %v2344_v26 = vld [vmem:[%s3510_s28 + $0xb4] ss:$8 sps:$4 sm:$0xff]  }
  0x25   :  { %522 = vmatprep.subr.bf16.mxu1 %v2279_v38  ;;  %v2339_v25 = vld [vmem:[%s3510_s28 + $0xa0] ss:$8 sps:$4 sm:$0xff]   ;;  %v2350_v30 = vld [vmem:[%s3510_s28 + $0xd4] ss:$8 sps:$4 sm:$0xff]  }
  0x26   :  { %276 = vmatpush1.bf16.msra.mxu0 %v2236_v20  ;;  %v2335_v20 = vld [vmem:[%s3510_s28 + $0x84] ss:$8 sps:$4 sm:$0xff]   ;;  %v2345_v29 = vld [vmem:[%s3510_s28 + $0xc0] ss:$8 sps:$4 sm:$0xff]   ;;  %v2368_v54 = vld [vmem:[%s3481_s9 + $0x34] ss:$8 sps:$4 sm:$0xff]  }
  0x27   :  { %277 = vmatprep.subr.bf16.mxu0 %v2237_v23  ;;  %v2336_v23 = vld [vmem:[%s3510_s28 + $0x90] ss:$8 sps:$4 sm:$0xff]   ;;  %v100_v33 = vld [vmem:[%s3511_s1 + $0x8] sm:$0xff] }
  0x28   :  { %523 = vmatpush1.bf16.msra.mxu1 %v2281_v40 }
  0x29   :  { %524 = vmatprep.subr.bf16.mxu1 %v2282_v42 }
  0x2a   :  { %278 = vmatpush1.bf16.msra.mxu0 %v2239_v24  ;;  %v2341_v24 = vld [vmem:[%s3510_s28 + $0xa4] ss:$8 sps:$4 sm:$0xff]  }
  0x2b   :  { %279 = vmatprep.subr.bf16.mxu0 %v2240_v27  ;;  %v2342_v27 = vld [vmem:[%s3510_s28 + $0xb0] ss:$8 sps:$4 sm:$0xff]  }
  0x2c   :  { %525 = vmatpush1.bf16.msra.mxu1 %v2284_v44  ;;  %v2353_v44 = vld [vmem:[%s3510_s28 + $0xe4] ss:$8 sps:$4 sm:$0xff]  }
  0x2d   :  { %526 = vmatprep.subr.bf16.mxu1 %v2285_v46  ;;  %v2356_v46 = vld [vmem:[%s3510_s28 + $0xf4] ss:$8 sps:$4 sm:$0xff]  }
  0x2e   :  { %280 = vmatpush1.bf16.msra.mxu0 %v2242_v28  ;;  %v2347_v28 = vld [vmem:[%s3510_s28 + $0xc4] ss:$8 sps:$4 sm:$0xff]  }
  0x2f   :  { %281 = vmatprep.subr.bf16.mxu0 %v2243_v31  ;;  %v2348_v31 = vld [vmem:[%s3510_s28 + $0xd0] ss:$8 sps:$4 sm:$0xff]  }
  0x30   :  { %527 = vmatpush1.bf16.msra.mxu1 %v2287_v48  ;;  %v2357_v48 = vld [vmem:[%s3481_s9] ss:$8 sps:$4 sm:$0xff]  }
  0x31   :  { %528 = vmatprep.subr.bf16.mxu1 %v2288_v50  ;;  %v2362_v50 = vld [vmem:[%s3481_s9 + $0x14] ss:$8 sps:$4 sm:$0xff]  }
  0x32   :  { %282 = vmatpush1.bf16.msra.mxu0 %v2245_v32  ;;  %v99_v32 = vld [vmem:[%s3511_s1] sm:$0xff] }
  0x33   :  { %283 = vmatprep.subr.bf16.mxu0 %v2246_v35 }
  0x34   :  { %529 = vmatpush1.bf16.msra.mxu1 %v2290_v52  ;;  %v2365_v52 = vld [vmem:[%s3481_s9 + $0x24] ss:$8 sps:$4 sm:$0xff]  }
  0x35   :  { %530 = vmatprep.subr.bf16.mxu1 %v2291_v55  ;;  %v2366_v55 = vld [vmem:[%s3481_s9 + $0x30] ss:$8 sps:$4 sm:$0xff]  }
  0x36   :  { %284 = vmatpush1.bf16.msra.mxu0 %v2248_v37 }
  0x37   :  { %285 = vmatprep.subr.bf16.mxu0 %v2249_v39 }
  0x38   :  { %531 = vmatpush1.bf16.msra.mxu1 %v2293_v57  ;;  %v2369_v57 = vld [vmem:[%s3481_s9 + $0x40] ss:$8 sps:$4 sm:$0xff]  }
  0x39   :  { %532 = vmatprep.subr.bf16.mxu1 %v2294_v58  ;;  %v2374_v58 = vld [vmem:[%s3481_s9 + $0x54] ss:$8 sps:$4 sm:$0xff]  }
  0x3a   :  { %286 = vmatpush1.bf16.msra.mxu0 %v2251_v41 }
  0x3b   :  { %287 = vmatprep.subr.bf16.mxu0 %v2252_v43 }
  0x3c   :  { %533 = vmatpush1.bf16.msra.mxu1 %v2296_v59  ;;  %v2372_v59 = vld [vmem:[%s3481_s9 + $0x50] ss:$8 sps:$4 sm:$0xff]  }
  0x3d   :  { %534 = vmatprep.subr.bf16.mxu1 %v2297_v60  ;;  %v2377_v60 = vld [vmem:[%s3481_s9 + $0x64] ss:$8 sps:$4 sm:$0xff]  }
  0x3e   :  { %288 = vmatpush1.bf16.msra.mxu0 %v2254_v45  ;;  %v2351_v45 = vld [vmem:[%s3510_s28 + $0xe0] ss:$8 sps:$4 sm:$0xff]  }
  0x3f   :  { %289 = vmatprep.subr.bf16.mxu0 %v2255_v47  ;;  %v2354_v47 = vld [vmem:[%s3510_s28 + $0xf0] ss:$8 sps:$4 sm:$0xff]  }
  0x40   :  { %535 = vmatpush1.bf16.msra.mxu1 %v2299_v61  ;;  %v2375_v61 = vld [vmem:[%s3481_s9 + $0x60] ss:$8 sps:$4 sm:$0xff]  }
  0x41   :  { %536 = vmatprep.subr.bf16.mxu1 %v2300_v62  ;;  %v2380_v62 = vld [vmem:[%s3481_s9 + $0x74] ss:$8 sps:$4 sm:$0xff]  }
  0x42   :  { %290 = vmatpush1.bf16.msra.mxu0 %v2257_v49  ;;  %v2359_v49 = vld [vmem:[%s3481_s9 + $0x4] ss:$8 sps:$4 sm:$0xff]  }
  0x43   :  { %291 = vmatprep.subr.bf16.mxu0 %v2258_v51  ;;  %v2360_v51 = vld [vmem:[%s3481_s9 + $0x10] ss:$8 sps:$4 sm:$0xff]  }
  0x44   :  { %537 = vmatpush1.bf16.msra.mxu1 %v2302_v63  ;;  %v2378_v63 = vld [vmem:[%s3481_s9 + $0x70] ss:$8 sps:$4 sm:$0xff]  }
  0x45   :  { %538 = vmatprep.subr.bf16.mxu1 %v2303_v0  ;;  %v2383_v0 = vld [vmem:[%s3481_s9 + $0x84] ss:$8 sps:$4 sm:$0xff]  }
  0x46   :  { %292 = vmatpush1.bf16.msra.mxu0 %v2260_v53  ;;  %v2363_v53 = vld [vmem:[%s3481_s9 + $0x20] ss:$8 sps:$4 sm:$0xff]  }
  0x47   :  { %759 = vmatprep.subr.bf16.mxu0 %v2311_v5  ;;  %v2387_v5 = vld [vmem:[%s3481_s9 + $0xa0] ss:$8 sps:$4 sm:$0xff]  }
  0x48   :  { %539 = vmatpush1.bf16.msra.mxu1 %v2305_v1  ;;  %v2381_v1 = vld [vmem:[%s3481_s9 + $0x80] ss:$8 sps:$4 sm:$0xff]  }
  0x49   :  { %294 = vmatmul.mubr.bf16.vlgmr.msra.gmra.mrb[0].mxu0 %v97_v56  ;;  %540 = vmatprep.subr.bf16.mxu1 %v2306_v2  ;;  %v2371_v56 = vld [vmem:[%s3481_s9 + $0x44] ss:$8 sps:$4 sm:$0xff]   ;;  %v2386_v2 = vld [vmem:[%s3481_s9 + $0x94] ss:$8 sps:$4 sm:$0xff]  }
  0x4a   :  { %760 = vmatpush1.bf16.msra.mxu0 %v2309_v4  ;;  %v2389_v4 = vld [vmem:[%s3481_s9 + $0xa4] ss:$8 sps:$4 sm:$0xff]  }
  0x4b   :  { %761 = vmatprep.subr.bf16.mxu0 %v2314_v6  ;;  %v2392_v6 = vld [vmem:[%s3481_s9 + $0xb4] ss:$8 sps:$4 sm:$0xff]  }
  0x4c   :  { %541 = vmatpush1.bf16.msra.mxu1 %v2308_v3  ;;  %v2384_v3 = vld [vmem:[%s3481_s9 + $0x90] ss:$8 sps:$4 sm:$0xff]  }
  0x4d   :  { %1008 = vmatprep.subr.bf16.mxu1 %v2359_v49 }
  0x4e   :  { %762 = vmatpush1.bf16.msra.mxu0 %v2312_v7  ;;  %v2390_v7 = vld [vmem:[%s3481_s9 + $0xb0] ss:$8 sps:$4 sm:$0xff]  }
  0x4f   :  { %763 = vmatprep.subr.bf16.mxu0 %v2317_v8  ;;  %v2395_v8 = vld [vmem:[%s3481_s9 + $0xc4] ss:$8 sps:$4 sm:$0xff]  }
  0x52   :  { %764 = vmatpush1.bf16.msra.mxu0 %v2315_v9  ;;  %v2393_v9 = vld [vmem:[%s3481_s9 + $0xc0] ss:$8 sps:$4 sm:$0xff]  }
  0x53   :  { %765 = vmatprep.subr.bf16.mxu0 %v2320_v10  ;;  %v2398_v10 = vld [vmem:[%s3481_s9 + $0xd4] ss:$8 sps:$4 sm:$0xff]  }
  0x56   :  { %766 = vmatpush1.bf16.msra.mxu0 %v2318_v11  ;;  %v2396_v11 = vld [vmem:[%s3481_s9 + $0xd0] ss:$8 sps:$4 sm:$0xff]  }
  0x57   :  { %767 = vmatprep.subr.bf16.mxu0 %v2323_v12  ;;  %v340_v12 = vlaneseq }
  0x5a   :  { %768 = vmatpush1.bf16.msra.mxu0 %v2321_v13  ;;  %v341_v13 = vshrl.u32 %v340_v12, 7  ;;  %v2447_v12 = vld [vmem:[%s3485_s12 + $0x60] ss:$8 sps:$4 sm:$0xff]  }
  0x5b   :  { %769 = vmatprep.subr.bf16.mxu0 %v2326_v14 }
  0x5c   :  { %v3073_v14 = vsub.s32 0, %v341_v13 }
  0x5e   :  { %770 = vmatpush1.bf16.msra.mxu0 %v2324_v15  ;;  %v338_v15 = vld [vmem:[%s3482_s6] sm:$0x3] }
  0x5f   :  { %771 = vmatprep.subr.bf16.mxu0 %v2329_v16  ;;  %v3078_v16 = vsub.s32 1, %v341_v13  ;;  %v2452_v13 = vld [vmem:[%s3485_s12 + $0x74] ss:$8 sps:$4 sm:$0xff]  }
  0x62   :  { %772 = vmatpush1.bf16.msra.mxu0 %v2327_v17  ;;  %v343_v17 = vrot.slane %v338_v15, %v3073_v14 }
  0x63   :  { %773 = vmatprep.subr.bf16.mxu0 %v2332_v18  ;;  %v347_v18 = vrot.slane %v338_v15, %v3078_v16  ;;  %v2450_v15 = vld [vmem:[%s3485_s12 + $0x70] ss:$8 sps:$4 sm:$0xff]  }
  0x66   :  { %774 = vmatpush1.bf16.msra.mxu0 %v2330_v19 }
  0x67   :  { %775 = vmatprep.subr.bf16.mxu0 %v2335_v20 }
  0x6a   :  { %776 = vmatpush1.bf16.msra.mxu0 %v2333_v21 }
  0x6b   :  { %777 = vmatprep.subr.bf16.mxu0 %v2338_v22 }
  0x6e   :  { %778 = vmatpush1.bf16.msra.mxu0 %v2336_v23 }
  0x6f   :  { %779 = vmatprep.subr.bf16.mxu0 %v2341_v24 }
  0x72   :  { %780 = vmatpush1.bf16.msra.mxu0 %v2339_v25 }
  0x73   :  { %781 = vmatprep.subr.bf16.mxu0 %v2344_v26 }
  0x76   :  { %782 = vmatpush1.bf16.msra.mxu0 %v2342_v27 }
  0x77   :  { %783 = vmatprep.subr.bf16.mxu0 %v2347_v28 }
  0x7a   :  { %784 = vmatpush1.bf16.msra.mxu0 %v2345_v29  ;;  %v2401_v29 = vld [vmem:[%s3481_s9 + $0xe4] ss:$8 sps:$4 sm:$0xff]  }
  0x7b   :  { %785 = vmatprep.subr.bf16.mxu0 %v2350_v30  ;;  %v2399_v30 = vld [vmem:[%s3481_s9 + $0xe0] ss:$8 sps:$4 sm:$0xff]  }
  0x7e   :  { %786 = vmatpush1.bf16.msra.mxu0 %v2348_v31  ;;  %v2404_v31 = vld [vmem:[%s3481_s9 + $0xf4] ss:$8 sps:$4 sm:$0xff]  }
  0x7f   :  { %787 = vmatprep.subr.bf16.mxu0 %v2353_v44 }
  0x82   :  { %788 = vmatpush1.bf16.msra.mxu0 %v2351_v45 }
  0x83   :  { %789 = vmatprep.subr.bf16.mxu0 %v2356_v46 }
  0x86   :  { %790 = vmatpush1.bf16.msra.mxu0 %v2354_v47 }
 0x11c   :  { %v295_v34 = vpop.f32.mrb[0].mxu0 }
 0x11d   :  { %v296_v35 = vadd.f32 %v295_v34, %v99_v32  ;;  %v297_v36 = vpop.f32.mrb[1].mxu0  ;;  %v2402_v32 = vld [vmem:[%s3481_s9 + $0xf0] ss:$8 sps:$4 sm:$0xff]   ;;  %v2407_v34 = vld [vmem:[%s3483_s11 + $0x4] ss:$8 sps:$4 sm:$0xff]  }
 0x11e   :  { %v298_v37 = vadd.f32 %v297_v36, %v100_v33  ;;  %v299_v38 = vpop.f32.mrb[2].mxu0  ;;  %v2405_v33 = vld [vmem:[%s3483_s11] ss:$8 sps:$4 sm:$0xff]   ;;  %v2410_v36 = vld [vmem:[%s3483_s11 + $0x14] ss:$8 sps:$4 sm:$0xff]   ;;  %1156 = vmatprep.subr.bf16.mxu0 %v2407_v34 }
 0x11f   :  { %v302_v39 = vmax.f32 %v296_v35, 0.0  ;;  %v300_v40 = vpop.f32.mrb[3].mxu0  ;;  %v2408_v35 = vld [vmem:[%s3483_s11 + $0x10] ss:$8 sps:$4 sm:$0xff]  }
 0x120   :  { %v303_v41 = vmax.f32 %v298_v37, 0.0  ;;  %v587_v37 = vld [vmem:[%s3484_s8] sm:$0x3] }
 0x121   :  { %v336_v43 = vpack.c.bf16 %v302_v39, %v302_v39  ;;  %v592_v38 = vrot.slane %v587_v37, %v3073_v14  ;;  %v596_v39 = vrot.slane %v587_v37, %v3078_v16 }
 0x122   :  { %v337_v42 = vpack.c.bf16 %v303_v41, %v303_v41 }
 0x124   :  { %542 = vmatprep.mubr.bf16.mxu1 %v337_v42 }
 0x125   :  { %543 = vmatmul.mubr.bf16.vlgmr.msra.gmra.mrb[0].mxu1 %v336_v43 }
 0x126   :  { %1009 = vmatpush1.bf16.msra.mxu1 %v2357_v48 }
 0x127   :  { %1010 = vmatprep.subr.bf16.mxu1 %v2362_v50  ;;  %v2413_v50 = vld [vmem:[%s3483_s11 + $0x24] ss:$8 sps:$4 sm:$0xff]  }
 0x12a   :  { %1011 = vmatpush1.bf16.msra.mxu1 %v2360_v51  ;;  %v2411_v51 = vld [vmem:[%s3483_s11 + $0x20] ss:$8 sps:$4 sm:$0xff]  }
 0x12b   :  { %1012 = vmatprep.subr.bf16.mxu1 %v2365_v52  ;;  %v2416_v52 = vld [vmem:[%s3483_s11 + $0x34] ss:$8 sps:$4 sm:$0xff]  }
 0x12e   :  { %1013 = vmatpush1.bf16.msra.mxu1 %v2363_v53  ;;  %v2414_v53 = vld [vmem:[%s3483_s11 + $0x30] ss:$8 sps:$4 sm:$0xff]  }
 0x12f   :  { %1014 = vmatprep.subr.bf16.mxu1 %v2368_v54  ;;  %v2419_v54 = vld [vmem:[%s3483_s11 + $0x44] ss:$8 sps:$4 sm:$0xff]  }
 0x132   :  { %1015 = vmatpush1.bf16.msra.mxu1 %v2366_v55  ;;  %v2417_v55 = vld [vmem:[%s3483_s11 + $0x40] ss:$8 sps:$4 sm:$0xff]  }
 0x133   :  { %1016 = vmatprep.subr.bf16.mxu1 %v2371_v56  ;;  %v2422_v56 = vld [vmem:[%s3483_s11 + $0x54] ss:$8 sps:$4 sm:$0xff]  }
 0x136   :  { %1017 = vmatpush1.bf16.msra.mxu1 %v2369_v57  ;;  %v2420_v57 = vld [vmem:[%s3483_s11 + $0x50] ss:$8 sps:$4 sm:$0xff]  }
 0x137   :  { %1018 = vmatprep.subr.bf16.mxu1 %v2374_v58  ;;  %v2425_v58 = vld [vmem:[%s3483_s11 + $0x64] ss:$8 sps:$4 sm:$0xff]  }
 0x13a   :  { %1019 = vmatpush1.bf16.msra.mxu1 %v2372_v59  ;;  %v2583_v59 = vmov 0  }
 0x13b   :  { %1020 = vmatprep.subr.bf16.mxu1 %v2377_v60  ;;  %v2423_v60 = vld [vmem:[%s3483_s11 + $0x60] ss:$8 sps:$4 sm:$0xff]  }
 0x13e   :  { %1021 = vmatpush1.bf16.msra.mxu1 %v2375_v61  ;;  %v2428_v61 = vld [vmem:[%s3483_s11 + $0x74] ss:$8 sps:$4 sm:$0xff]  }
 0x13f   :  { %1022 = vmatprep.subr.bf16.mxu1 %v2380_v62  ;;  %v2426_v62 = vld [vmem:[%s3483_s11 + $0x70] ss:$8 sps:$4 sm:$0xff]  }
 0x142   :  { %1023 = vmatpush1.bf16.msra.mxu1 %v2378_v63  ;;  %v2429_v63 = vld [vmem:[%s3485_s12] ss:$8 sps:$4 sm:$0xff]  }
 0x143   :  { %1024 = vmatprep.subr.bf16.mxu1 %v2383_v0  ;;  %v2431_v0 = vld [vmem:[%s3485_s12 + $0x4] ss:$8 sps:$4 sm:$0xff]  }
 0x146   :  { %1025 = vmatpush1.bf16.msra.mxu1 %v2381_v1  ;;  %v2434_v1 = vld [vmem:[%s3485_s12 + $0x14] ss:$8 sps:$4 sm:$0xff]  }
 0x147   :  { %1026 = vmatprep.subr.bf16.mxu1 %v2386_v2  ;;  %v2432_v2 = vld [vmem:[%s3485_s12 + $0x10] ss:$8 sps:$4 sm:$0xff]  }
 0x14a   :  { %1027 = vmatpush1.bf16.msra.mxu1 %v2384_v3  ;;  %v2437_v3 = vld [vmem:[%s3485_s12 + $0x24] ss:$8 sps:$4 sm:$0xff]  }
 0x14b   :  { %1028 = vmatprep.subr.bf16.mxu1 %v2389_v4  ;;  %v2435_v4 = vld [vmem:[%s3485_s12 + $0x20] ss:$8 sps:$4 sm:$0xff]  }
 0x14e   :  { %1029 = vmatpush1.bf16.msra.mxu1 %v2387_v5  ;;  %v2440_v5 = vld [vmem:[%s3485_s12 + $0x34] ss:$8 sps:$4 sm:$0xff]  }
 0x14f   :  { %1030 = vmatprep.subr.bf16.mxu1 %v2392_v6  ;;  %v2438_v6 = vld [vmem:[%s3485_s12 + $0x30] ss:$8 sps:$4 sm:$0xff]  }
 0x152   :  { %1031 = vmatpush1.bf16.msra.mxu1 %v2390_v7  ;;  %v2443_v7 = vld [vmem:[%s3485_s12 + $0x44] ss:$8 sps:$4 sm:$0xff]  }
 0x153   :  { %1032 = vmatprep.subr.bf16.mxu1 %v2395_v8  ;;  %v2441_v8 = vld [vmem:[%s3485_s12 + $0x40] ss:$8 sps:$4 sm:$0xff]  }
 0x156   :  { %1033 = vmatpush1.bf16.msra.mxu1 %v2393_v9  ;;  %v2446_v9 = vld [vmem:[%s3485_s12 + $0x54] ss:$8 sps:$4 sm:$0xff]  }
 0x157   :  { %1034 = vmatprep.subr.bf16.mxu1 %v2398_v10  ;;  %v2444_v10 = vld [vmem:[%s3485_s12 + $0x50] ss:$8 sps:$4 sm:$0xff]  }
 0x15a   :  { %1035 = vmatpush1.bf16.msra.mxu1 %v2396_v11  ;;  %v2449_v11 = vld [vmem:[%s3485_s12 + $0x64] ss:$8 sps:$4 sm:$0xff]  }
 0x15b   :  { %1036 = vmatprep.subr.bf16.mxu1 %v2401_v29  ;;  %v836_v29 = vld [vmem:[%s3486_s10] sm:$0x3] }
 0x15e   :  { %1037 = vmatpush1.bf16.msra.mxu1 %v2399_v30  ;;  %v841_v30 = vrot.slane %v836_v29, %v3073_v14 }
 0x15f   :  { %1038 = vmatprep.subr.bf16.mxu1 %v2404_v31  ;;  %v845_v31 = vrot.slane %v836_v29, %v3078_v16  ;;  %v2524_v29 = vld [vmem:[%s3490_s14 + $0xf4] ss:$8 sps:$4 sm:$0xff]  }
 0x162   :  { %1039 = vmatpush1.bf16.msra.mxu1 %v2402_v32 }
 0x163   :  { %1405 = vmatprep.subr.bf16.mxu1 %v2431_v0  ;;  %v2498_v0 = vld [vmem:[%s3490_s14 + $0x70] ss:$8 sps:$4 sm:$0xff]  }
 0x1f8   :  { %v544_v19 = vpop.f32.mrb[0].mxu1 }
 0x1f9   :  { %v545_v20 = vadd.f32 %v544_v19, %v343_v17  ;;  %v546_v21 = vpop.f32.mrb[1].mxu1  ;;  %v2455_v17 = vld [vmem:[%s3485_s12 + $0x84] ss:$8 sps:$4 sm:$0xff]   ;;  %v2458_v19 = vld [vmem:[%s3485_s12 + $0x94] ss:$8 sps:$4 sm:$0xff]  }
 0x1fa   :  { %v547_v22 = vadd.f32 %v546_v21, %v347_v18  ;;  %v548_v23 = vpop.f32.mrb[2].mxu1  ;;  %v2453_v18 = vld [vmem:[%s3485_s12 + $0x80] ss:$8 sps:$4 sm:$0xff]   ;;  %v2461_v21 = vld [vmem:[%s3485_s12 + $0xa4] ss:$8 sps:$4 sm:$0xff]  }
 0x1fb   :  { %v551_v24 = vmax.f32 %v545_v20, 0.0  ;;  %v549_v25 = vpop.f32.mrb[3].mxu1  ;;  %v2456_v20 = vld [vmem:[%s3485_s12 + $0x90] ss:$8 sps:$4 sm:$0xff]   ;;  %v2464_v23 = vld [vmem:[%s3485_s12 + $0xb4] ss:$8 sps:$4 sm:$0xff]  }
 0x1fc   :  { %v552_v26 = vmax.f32 %v547_v22, 0.0  ;;  %v2459_v22 = vld [vmem:[%s3485_s12 + $0xa0] ss:$8 sps:$4 sm:$0xff]   ;;  %v2467_v25 = vld [vmem:[%s3485_s12 + $0xc4] ss:$8 sps:$4 sm:$0xff]  }
 0x1fd   :  { %v585_v28 = vpack.c.bf16 %v551_v24, %v551_v24  ;;  %v2462_v24 = vld [vmem:[%s3485_s12 + $0xb0] ss:$8 sps:$4 sm:$0xff]  }
 0x1fe   :  { %v586_v27 = vpack.c.bf16 %v552_v26, %v552_v26  ;;  %v2465_v26 = vld [vmem:[%s3485_s12 + $0xc0] ss:$8 sps:$4 sm:$0xff]  }
 0x200   :  { %791 = vmatprep.mubr.bf16.mxu0 %v586_v27  ;;  %v2470_v27 = vld [vmem:[%s3485_s12 + $0xd4] ss:$8 sps:$4 sm:$0xff]  }
 0x201   :  { %792 = vmatmul.mubr.bf16.vlgmr.msra.gmra.mrb[4].mxu0 %v585_v28  ;;  %v2468_v28 = vld [vmem:[%s3485_s12 + $0xd0] ss:$8 sps:$4 sm:$0xff]  }
 0x202   :  { %1157 = vmatpush1.bf16.msra.mxu0 %v2405_v33  ;;  %1188 = vmatprep.mubr.bf16.mxu0 %v2583_v59  ;;  %v2494_v59 = vld [vmem:[%s3490_s14 + $0x54] ss:$8 sps:$4 sm:$0xff]  }
 0x203   :  { %1158 = vmatprep.subr.bf16.mxu0 %v2410_v36 }
 0x206   :  { %1159 = vmatpush1.bf16.msra.mxu0 %v2408_v35 }
 0x207   :  { %1160 = vmatprep.subr.bf16.mxu0 %v2413_v50  ;;  %v2479_v50 = vld [vmem:[%s3490_s14 + $0x4] ss:$8 sps:$4 sm:$0xff]  }
 0x20a   :  { %1161 = vmatpush1.bf16.msra.mxu0 %v2411_v51  ;;  %v2482_v51 = vld [vmem:[%s3490_s14 + $0x14] ss:$8 sps:$4 sm:$0xff]  }
 0x20b   :  { %1162 = vmatprep.subr.bf16.mxu0 %v2416_v52  ;;  %v2480_v52 = vld [vmem:[%s3490_s14 + $0x10] ss:$8 sps:$4 sm:$0xff]  }
 0x20e   :  { %1163 = vmatpush1.bf16.msra.mxu0 %v2414_v53  ;;  %v2485_v53 = vld [vmem:[%s3490_s14 + $0x24] ss:$8 sps:$4 sm:$0xff]  }
 0x20f   :  { %1164 = vmatprep.subr.bf16.mxu0 %v2419_v54  ;;  %v2483_v54 = vld [vmem:[%s3490_s14 + $0x20] ss:$8 sps:$4 sm:$0xff]  }
 0x212   :  { %1165 = vmatpush1.bf16.msra.mxu0 %v2417_v55  ;;  %v2488_v55 = vld [vmem:[%s3490_s14 + $0x34] ss:$8 sps:$4 sm:$0xff]  }
 0x213   :  { %1166 = vmatprep.subr.bf16.mxu0 %v2422_v56  ;;  %v2486_v56 = vld [vmem:[%s3490_s14 + $0x30] ss:$8 sps:$4 sm:$0xff]  }
 0x216   :  { %1167 = vmatpush1.bf16.msra.mxu0 %v2420_v57  ;;  %v2491_v57 = vld [vmem:[%s3490_s14 + $0x44] ss:$8 sps:$4 sm:$0xff]  }
 0x217   :  { %1168 = vmatprep.subr.bf16.mxu0 %v2425_v58  ;;  %v2489_v58 = vld [vmem:[%s3490_s14 + $0x40] ss:$8 sps:$4 sm:$0xff]  }
 0x21a   :  { %1169 = vmatpush1.bf16.msra.mxu0 %v2423_v60  ;;  %v2492_v60 = vld [vmem:[%s3490_s14 + $0x50] ss:$8 sps:$4 sm:$0xff]  }
 0x21b   :  { %1170 = vmatprep.subr.bf16.mxu0 %v2428_v61  ;;  %v2497_v61 = vld [vmem:[%s3490_s14 + $0x64] ss:$8 sps:$4 sm:$0xff]  }
 0x21e   :  { %1171 = vmatpush1.bf16.msra.mxu0 %v2426_v62  ;;  %v2495_v62 = vld [vmem:[%s3490_s14 + $0x60] ss:$8 sps:$4 sm:$0xff]  }
 0x21f   :  { %1654 = vmatprep.subr.bf16.mxu0 %v2479_v50  ;;  %v2552_v50 = vld [vmem:[%s3492_s16 + $0x90] ss:$8 sps:$4 sm:$0xff]  }
 0x2d4   :  { %v793_v40 = vpop.f32.mrb[4].mxu0 }
 0x2d5   :  { %v794_v41 = vadd.f32 %v793_v40, %v592_v38  ;;  %v795_v42 = vpop.f32.mrb[5].mxu0  ;;  %v1054_v40 = vld [vmem:[%s3489_s3] sm:$0xff] }
 0x2d6   :  { %v796_v43 = vadd.f32 %v795_v42, %v596_v39  ;;  %v797_v44 = vpop.f32.mrb[6].mxu0 }
 0x2d7   :  { %v800_v45 = vmax.f32 %v794_v41, 0.0  ;;  %v798_v46 = vpop.f32.mrb[7].mxu0 }
 0x2d8   :  { %v801_v47 = vmax.f32 %v796_v43, 0.0  ;;  %v2471_v46 = vld [vmem:[%s3485_s12 + $0xe0] ss:$8 sps:$4 sm:$0xff]  }
 0x2d9   :  { %v834_v49 = vpack.c.bf16 %v800_v45, %v800_v45  ;;  %v2473_v45 = vld [vmem:[%s3485_s12 + $0xe4] ss:$8 sps:$4 sm:$0xff]  }
 0x2da   :  { %v835_v48 = vpack.c.bf16 %v801_v47, %v801_v47  ;;  %v2476_v47 = vld [vmem:[%s3485_s12 + $0xf4] ss:$8 sps:$4 sm:$0xff]  }
 0x2dc   :  { %1040 = vmatprep.mubr.bf16.mxu1 %v835_v48  ;;  %v2474_v48 = vld [vmem:[%s3485_s12 + $0xf0] ss:$8 sps:$4 sm:$0xff]  }
 0x2dd   :  { %1041 = vmatmul.mubr.bf16.vlgmr.msra.gmra.mrb[4].mxu1 %v834_v49  ;;  %v2477_v49 = vld [vmem:[%s3490_s14] ss:$8 sps:$4 sm:$0xff]  }
 0x2de   :  { %1406 = vmatpush1.bf16.msra.mxu1 %v2429_v63  ;;  %v2500_v63 = vld [vmem:[%s3490_s14 + $0x74] ss:$8 sps:$4 sm:$0xff]  }
 0x2df   :  { %1407 = vmatprep.subr.bf16.mxu1 %v2434_v1  ;;  %v2503_v1 = vld [vmem:[%s3490_s14 + $0x84] ss:$8 sps:$4 sm:$0xff]  }
 0x2e2   :  { %1408 = vmatpush1.bf16.msra.mxu1 %v2432_v2  ;;  %v2501_v2 = vld [vmem:[%s3490_s14 + $0x80] ss:$8 sps:$4 sm:$0xff]  }
 0x2e3   :  { %1409 = vmatprep.subr.bf16.mxu1 %v2437_v3  ;;  %v2506_v3 = vld [vmem:[%s3490_s14 + $0x94] ss:$8 sps:$4 sm:$0xff]  }
 0x2e6   :  { %1410 = vmatpush1.bf16.msra.mxu1 %v2435_v4  ;;  %v2504_v4 = vld [vmem:[%s3490_s14 + $0x90] ss:$8 sps:$4 sm:$0xff]  }
 0x2e7   :  { %1411 = vmatprep.subr.bf16.mxu1 %v2440_v5  ;;  %v2509_v5 = vld [vmem:[%s3490_s14 + $0xa4] ss:$8 sps:$4 sm:$0xff]  }
 0x2ea   :  { %1412 = vmatpush1.bf16.msra.mxu1 %v2438_v6  ;;  %v2507_v6 = vld [vmem:[%s3490_s14 + $0xa0] ss:$8 sps:$4 sm:$0xff]  }
 0x2eb   :  { %1413 = vmatprep.subr.bf16.mxu1 %v2443_v7  ;;  %v2512_v7 = vld [vmem:[%s3490_s14 + $0xb4] ss:$8 sps:$4 sm:$0xff]  }
 0x2ee   :  { %1414 = vmatpush1.bf16.msra.mxu1 %v2441_v8  ;;  %v2510_v8 = vld [vmem:[%s3490_s14 + $0xb0] ss:$8 sps:$4 sm:$0xff]  }
 0x2ef   :  { %1415 = vmatprep.subr.bf16.mxu1 %v2446_v9  ;;  %v2515_v9 = vld [vmem:[%s3490_s14 + $0xc4] ss:$8 sps:$4 sm:$0xff]  }
 0x2f2   :  { %1416 = vmatpush1.bf16.msra.mxu1 %v2444_v10  ;;  %v2513_v10 = vld [vmem:[%s3490_s14 + $0xc0] ss:$8 sps:$4 sm:$0xff]  }
 0x2f3   :  { %1417 = vmatprep.subr.bf16.mxu1 %v2449_v11  ;;  %v2518_v11 = vld [vmem:[%s3490_s14 + $0xd4] ss:$8 sps:$4 sm:$0xff]  }
 0x2f6   :  { %1418 = vmatpush1.bf16.msra.mxu1 %v2447_v12  ;;  %v2516_v12 = vld [vmem:[%s3490_s14 + $0xd0] ss:$8 sps:$4 sm:$0xff]  }
 0x2f7   :  { %1419 = vmatprep.subr.bf16.mxu1 %v2452_v13  ;;  %v1074_v13 = vld [vmem:[%s3491_s2] sm:$0xff] }
 0x2fa   :  { %1420 = vmatpush1.bf16.msra.mxu1 %v2450_v15  ;;  %v1075_v15 = vld [vmem:[%s3491_s2 + $0x8] sm:$0xff] }
 0x2fb   :  { %1421 = vmatprep.subr.bf16.mxu1 %v2455_v17 }
 0x2fe   :  { %1422 = vmatpush1.bf16.msra.mxu1 %v2453_v18 }
 0x2ff   :  { %1423 = vmatprep.subr.bf16.mxu1 %v2458_v19 }
 0x302   :  { %1424 = vmatpush1.bf16.msra.mxu1 %v2456_v20 }
 0x303   :  { %1425 = vmatprep.subr.bf16.mxu1 %v2461_v21 }
 0x306   :  { %1426 = vmatpush1.bf16.msra.mxu1 %v2459_v22 }
 0x307   :  { %1427 = vmatprep.subr.bf16.mxu1 %v2464_v23 }
 0x30a   :  { %1428 = vmatpush1.bf16.msra.mxu1 %v2462_v24 }
 0x30b   :  { %1429 = vmatprep.subr.bf16.mxu1 %v2467_v25 }
 0x30e   :  { %1430 = vmatpush1.bf16.msra.mxu1 %v2465_v26 }
 0x30f   :  { %1431 = vmatprep.subr.bf16.mxu1 %v2470_v27  ;;  %v2521_v27 = vld [vmem:[%s3490_s14 + $0xe4] ss:$8 sps:$4 sm:$0xff]  }
 0x312   :  { %1432 = vmatpush1.bf16.msra.mxu1 %v2468_v28  ;;  %v2519_v28 = vld [vmem:[%s3490_s14 + $0xe0] ss:$8 sps:$4 sm:$0xff]  }
 0x313   :  { %1433 = vmatprep.subr.bf16.mxu1 %v2473_v45  ;;  %v2548_v45 = vld [vmem:[%s3492_s16 + $0x74] ss:$8 sps:$4 sm:$0xff]  }
 0x316   :  { %1434 = vmatpush1.bf16.msra.mxu1 %v2471_v46  ;;  %v2546_v46 = vld [vmem:[%s3492_s16 + $0x70] ss:$8 sps:$4 sm:$0xff]  }
 0x317   :  { %1435 = vmatprep.subr.bf16.mxu1 %v2476_v47  ;;  %v2551_v47 = vld [vmem:[%s3492_s16 + $0x84] ss:$8 sps:$4 sm:$0xff]  }
 0x31a   :  { %1436 = vmatpush1.bf16.msra.mxu1 %v2474_v48  ;;  %v2549_v48 = vld [vmem:[%s3492_s16 + $0x80] ss:$8 sps:$4 sm:$0xff]  }
 0x3b0   :  { %v1042_v32 = vpop.f32.mrb[4].mxu1 }
 0x3b1   :  { %v1043_v33 = vadd.f32 %v1042_v32, %v841_v30  ;;  %v1044_v34 = vpop.f32.mrb[5].mxu1  ;;  %v2522_v30 = vld [vmem:[%s3490_s14 + $0xf0] ss:$8 sps:$4 sm:$0xff]   ;;  %v2527_v32 = vld [vmem:[%s3492_s16 + $0x4] ss:$8 sps:$4 sm:$0xff]  }
 0x3b2   :  { %v1045_v35 = vadd.f32 %v1044_v34, %v845_v31  ;;  %v1046_v36 = vpop.f32.mrb[6].mxu1  ;;  %v2525_v31 = vld [vmem:[%s3492_s16] ss:$8 sps:$4 sm:$0xff]   ;;  %1903 = vmatprep.subr.bf16.mxu1 %v2527_v32  ;;  %v2528_v34 = vld [vmem:[%s3492_s16 + $0x10] ss:$8 sps:$4 sm:$0xff]  }
 0x3b3   :  { %1049 = vst [vmem:[%s3487_s19] sm:$0xff] %v1043_v33  ;;  %v1047_v37 = vpop.f32.mrb[7].mxu1  ;;  %v2531_v36 = vld [vmem:[%s3492_s16 + $0x20] ss:$8 sps:$4 sm:$0xff]  }
 0x3b4   :  { %1050 = vst [vmem:[%s3488_s20] sm:$0xff] %v1045_v35  ;;  %v1051_v38 = vmul.f32 0.5, %v1045_v35  ;;  %v2533_v35 = vld [vmem:[%s3492_s16 + $0x24] ss:$8 sps:$4 sm:$0xff]   ;;  %v2536_v37 = vld [vmem:[%s3492_s16 + $0x34] ss:$8 sps:$4 sm:$0xff]  }
 0x3b6   :  { %v1052_v39 = vmul.f32 1.442695, %v1051_v38  ;;  %v2534_v38 = vld [vmem:[%s3492_s16 + $0x30] ss:$8 sps:$4 sm:$0xff]  }
 0x3b8   :  { %2573 = vpow2.f32 %v1052_v39  ;;  %v2539_v39 = vld [vmem:[%s3492_s16 + $0x44] ss:$8 sps:$4 sm:$0xff]  }
 0x3c2   :  { %v2574_v41 = vpop.eup %2573 }
 0x3c3   :  { %v1055_v42 = vmul.f32 %v2574_v41, %v1054_v40  ;;  %v2537_v40 = vld [vmem:[%s3492_s16 + $0x40] ss:$8 sps:$4 sm:$0xff]   ;;  %v2542_v41 = vld [vmem:[%s3492_s16 + $0x54] ss:$8 sps:$4 sm:$0xff]  }
 0x3c5   :  { %v1056_v43 = vadd.f32 %v1055_v42, %v1043_v33  ;;  %v2530_v33 = vld [vmem:[%s3492_s16 + $0x14] ss:$8 sps:$4 sm:$0xff]   ;;  %v2540_v42 = vld [vmem:[%s3492_s16 + $0x50] ss:$8 sps:$4 sm:$0xff]  }
 0x3c7   :  { %v1073_v44 = vpack.c.bf16 %v1056_v43, %v1056_v43  ;;  %v2545_v43 = vld [vmem:[%s3492_s16 + $0x64] ss:$8 sps:$4 sm:$0xff]  }
 0x3c9   :  { %1189 = vmatmul.mubr.bf16.vlgmr.msra.gmra.mrb[8].mxu0 %v1073_v44  ;;  %v2543_v44 = vld [vmem:[%s3492_s16 + $0x60] ss:$8 sps:$4 sm:$0xff]  }
 0x3ca   :  { %1655 = vmatpush1.bf16.msra.mxu0 %v2477_v49  ;;  %v2554_v49 = vld [vmem:[%s3492_s16 + $0x94] ss:$8 sps:$4 sm:$0xff]  }
 0x3cb   :  { %1656 = vmatprep.subr.bf16.mxu0 %v2482_v51  ;;  %v2557_v51 = vld [vmem:[%s3492_s16 + $0xa4] ss:$8 sps:$4 sm:$0xff]  }
 0x3ce   :  { %1657 = vmatpush1.bf16.msra.mxu0 %v2480_v52  ;;  %v2555_v52 = vld [vmem:[%s3492_s16 + $0xa0] ss:$8 sps:$4 sm:$0xff]  }
 0x3cf   :  { %1658 = vmatprep.subr.bf16.mxu0 %v2485_v53  ;;  %v2560_v53 = vld [vmem:[%s3492_s16 + $0xb4] ss:$8 sps:$4 sm:$0xff]  }
 0x3d2   :  { %1659 = vmatpush1.bf16.msra.mxu0 %v2483_v54  ;;  %v2558_v54 = vld [vmem:[%s3492_s16 + $0xb0] ss:$8 sps:$4 sm:$0xff]  }
 0x3d3   :  { %1660 = vmatprep.subr.bf16.mxu0 %v2488_v55  ;;  %v2563_v55 = vld [vmem:[%s3492_s16 + $0xc4] ss:$8 sps:$4 sm:$0xff]  }
 0x3d6   :  { %1661 = vmatpush1.bf16.msra.mxu0 %v2486_v56  ;;  %v2561_v56 = vld [vmem:[%s3492_s16 + $0xc0] ss:$8 sps:$4 sm:$0xff]  }
 0x3d7   :  { %1662 = vmatprep.subr.bf16.mxu0 %v2491_v57  ;;  %v2566_v57 = vld [vmem:[%s3492_s16 + $0xd4] ss:$8 sps:$4 sm:$0xff]  }
 0x3da   :  { %1663 = vmatpush1.bf16.msra.mxu0 %v2489_v58  ;;  %v2564_v58 = vld [vmem:[%s3492_s16 + $0xd0] ss:$8 sps:$4 sm:$0xff]  }
 0x3db   :  { %1664 = vmatprep.subr.bf16.mxu0 %v2494_v59  ;;  %v1233_v59 = vld [vmem:[%s3493_s13] sm:$0x3] }
 0x3de   :  { %1665 = vmatpush1.bf16.msra.mxu0 %v2492_v60  ;;  %v1238_v60 = vrot.slane %v1233_v59, %v3073_v14 }
 0x3df   :  { %1666 = vmatprep.subr.bf16.mxu0 %v2497_v61  ;;  %v1242_v61 = vrot.slane %v1233_v59, %v3078_v16 }
 0x3e2   :  { %1667 = vmatpush1.bf16.msra.mxu0 %v2495_v62 }
 0x3e3   :  { %1668 = vmatprep.subr.bf16.mxu0 %v2500_v63 }
 0x3e6   :  { %1669 = vmatpush1.bf16.msra.mxu0 %v2498_v0 }
 0x3e7   :  { %1670 = vmatprep.subr.bf16.mxu0 %v2503_v1 }
 0x3ea   :  { %1671 = vmatpush1.bf16.msra.mxu0 %v2501_v2 }
 0x3eb   :  { %1672 = vmatprep.subr.bf16.mxu0 %v2506_v3 }
 0x3ee   :  { %1673 = vmatpush1.bf16.msra.mxu0 %v2504_v4 }
 0x3ef   :  { %1674 = vmatprep.subr.bf16.mxu0 %v2509_v5 }
 0x3f2   :  { %1675 = vmatpush1.bf16.msra.mxu0 %v2507_v6 }
 0x3f3   :  { %1676 = vmatprep.subr.bf16.mxu0 %v2512_v7 }
 0x3f6   :  { %1677 = vmatpush1.bf16.msra.mxu0 %v2510_v8  ;;  %v2569_v8 = vld [vmem:[%s3492_s16 + $0xe4] ss:$8 sps:$4 sm:$0xff]  }
 0x3f7   :  { %1678 = vmatprep.subr.bf16.mxu0 %v2515_v9  ;;  %v2567_v9 = vld [vmem:[%s3492_s16 + $0xe0] ss:$8 sps:$4 sm:$0xff]  }
 0x3fa   :  { %1679 = vmatpush1.bf16.msra.mxu0 %v2513_v10  ;;  %v2572_v10 = vld [vmem:[%s3492_s16 + $0xf4] ss:$8 sps:$4 sm:$0xff]  }
 0x3fb   :  { %1680 = vmatprep.subr.bf16.mxu0 %v2518_v11  ;;  %v2570_v11 = vld [vmem:[%s3492_s16 + $0xf0] ss:$8 sps:$4 sm:$0xff]  }
 0x3fe   :  { %1681 = vmatpush1.bf16.msra.mxu0 %v2516_v12  ;;  %v1482_v12 = vld [vmem:[%s3494_s15] sm:$0x3] }
 0x3ff   :  { %1682 = vmatprep.subr.bf16.mxu0 %v2521_v27  ;;  %v1731_v27 = vld [vmem:[%s3495_s17] sm:$0x3] }
 0x402   :  { %1683 = vmatpush1.bf16.msra.mxu0 %v2519_v28  ;;  %v1736_v28 = vrot.slane %v1731_v27, %v3073_v14 }
 0x403   :  { %1684 = vmatprep.subr.bf16.mxu0 %v2524_v29  ;;  %v1740_v29 = vrot.slane %v1731_v27, %v3078_v16 }
 0x406   :  { %1685 = vmatpush1.bf16.msra.mxu0 %v2522_v30 }
 0x49c   :  { %v1190_v17 = vpop.f32.mrb[8].mxu0 }
 0x49d   :  { %v1191_v18 = vadd.f32 %v1190_v17, %v1074_v13  ;;  %v1192_v19 = vpop.f32.mrb[9].mxu0  ;;  %v1487_v13 = vrot.slane %v1482_v12, %v3073_v14 }
 0x49e   :  { %v1193_v20 = vadd.f32 %v1192_v19, %v1075_v15  ;;  %v1194_v21 = vpop.f32.mrb[10].mxu0  ;;  %v1491_v15 = vrot.slane %v1482_v12, %v3078_v16 }
 0x49f   :  { %v1197_v22 = vmax.f32 %v1191_v18, 0.0  ;;  %v1195_v23 = vpop.f32.mrb[11].mxu0 }
 0x4a0   :  { %v1198_v24 = vmax.f32 %v1193_v20, 0.0 }
 0x4a1   :  { %v1231_v26 = vpack.c.bf16 %v1197_v22, %v1197_v22 }
 0x4a2   :  { %v1232_v25 = vpack.c.bf16 %v1198_v24, %v1198_v24 }
 0x4a4   :  { %1437 = vmatprep.mubr.bf16.mxu1 %v1232_v25 }
 0x4a5   :  { %1438 = vmatmul.mubr.bf16.vlgmr.msra.gmra.mrb[8].mxu1 %v1231_v26 }
 0x4a6   :  { %1904 = vmatpush1.bf16.msra.mxu1 %v2525_v31 }
 0x4a7   :  { %1905 = vmatprep.subr.bf16.mxu1 %v2530_v33 }
 0x4aa   :  { %1906 = vmatpush1.bf16.msra.mxu1 %v2528_v34 }
 0x4ab   :  { %1907 = vmatprep.subr.bf16.mxu1 %v2533_v35 }
 0x4ae   :  { %1908 = vmatpush1.bf16.msra.mxu1 %v2531_v36 }
 0x4af   :  { %1909 = vmatprep.subr.bf16.mxu1 %v2536_v37 }
 0x4b2   :  { %1910 = vmatpush1.bf16.msra.mxu1 %v2534_v38 }
 0x4b3   :  { %1911 = vmatprep.subr.bf16.mxu1 %v2539_v39 }
 0x4b6   :  { %1912 = vmatpush1.bf16.msra.mxu1 %v2537_v40 }
 0x4b7   :  { %1913 = vmatprep.subr.bf16.mxu1 %v2542_v41 }
 0x4ba   :  { %1914 = vmatpush1.bf16.msra.mxu1 %v2540_v42 }
 0x4bb   :  { %1915 = vmatprep.subr.bf16.mxu1 %v2545_v43 }
 0x4be   :  { %1916 = vmatpush1.bf16.msra.mxu1 %v2543_v44 }
 0x4bf   :  { %1917 = vmatprep.subr.bf16.mxu1 %v2548_v45 }
 0x4c2   :  { %1918 = vmatpush1.bf16.msra.mxu1 %v2546_v46 }
 0x4c3   :  { %1919 = vmatprep.subr.bf16.mxu1 %v2551_v47 }
 0x4c6   :  { %1920 = vmatpush1.bf16.msra.mxu1 %v2549_v48 }
 0x4c7   :  { %1921 = vmatprep.subr.bf16.mxu1 %v2554_v49 }
 0x4ca   :  { %1922 = vmatpush1.bf16.msra.mxu1 %v2552_v50 }
 0x4cb   :  { %1923 = vmatprep.subr.bf16.mxu1 %v2557_v51 }
 0x4ce   :  { %1924 = vmatpush1.bf16.msra.mxu1 %v2555_v52 }
 0x4cf   :  { %1925 = vmatprep.subr.bf16.mxu1 %v2560_v53 }
 0x4d2   :  { %1926 = vmatpush1.bf16.msra.mxu1 %v2558_v54 }
 0x4d3   :  { %1927 = vmatprep.subr.bf16.mxu1 %v2563_v55 }
 0x4d6   :  { %1928 = vmatpush1.bf16.msra.mxu1 %v2561_v56 }
 0x4d7   :  { %1929 = vmatprep.subr.bf16.mxu1 %v2566_v57 }
 0x4da   :  { %1930 = vmatpush1.bf16.msra.mxu1 %v2564_v58 }
 0x4db   :  { %1931 = vmatprep.subr.bf16.mxu1 %v2569_v8 }
 0x4de   :  { %1932 = vmatpush1.bf16.msra.mxu1 %v2567_v9 }
 0x4df   :  { %1933 = vmatprep.subr.bf16.mxu1 %v2572_v10 }
 0x4e2   :  { %1934 = vmatpush1.bf16.msra.mxu1 %v2570_v11 }
 0x578   :  { %v1439_v62 = vpop.f32.mrb[8].mxu1 }
 0x579   :  { %v1440_v63 = vadd.f32 %v1439_v62, %v1238_v60  ;;  %v1441_v0 = vpop.f32.mrb[9].mxu1 }
 0x57a   :  { %v1442_v1 = vadd.f32 %v1441_v0, %v1242_v61  ;;  %v1443_v2 = vpop.f32.mrb[10].mxu1 }
 0x57b   :  { %v1446_v3 = vmax.f32 %v1440_v63, 0.0  ;;  %v1444_v4 = vpop.f32.mrb[11].mxu1 }
 0x57c   :  { %v1447_v5 = vmax.f32 %v1442_v1, 0.0 }
 0x57d   :  { %v1480_v7 = vpack.c.bf16 %v1446_v3, %v1446_v3 }
 0x57e   :  { %v1481_v6 = vpack.c.bf16 %v1447_v5, %v1447_v5 }
 0x580   :  { %1686 = vmatprep.mubr.bf16.mxu0 %v1481_v6 }
 0x581   :  { %1687 = vmatmul.mubr.bf16.vlgmr.msra.gmra.mrb[12].mxu0 %v1480_v7 }
 0x654   :  { %v1688_v17 = vpop.f32.mrb[12].mxu0 }
 0x655   :  { %v1689_v18 = vadd.f32 %v1688_v17, %v1487_v13  ;;  %v1690_v19 = vpop.f32.mrb[13].mxu0 }
 0x656   :  { %v1691_v20 = vadd.f32 %v1690_v19, %v1491_v15  ;;  %v1692_v21 = vpop.f32.mrb[14].mxu0 }
 0x657   :  { %v1695_v22 = vmax.f32 %v1689_v18, 0.0  ;;  %v1693_v23 = vpop.f32.mrb[15].mxu0 }
 0x658   :  { %v1696_v24 = vmax.f32 %v1691_v20, 0.0 }
 0x659   :  { %v1729_v26 = vpack.c.bf16 %v1695_v22, %v1695_v22 }
 0x65a   :  { %v1730_v25 = vpack.c.bf16 %v1696_v24, %v1696_v24 }
 0x65c   :  { %1935 = vmatprep.mubr.bf16.mxu1 %v1730_v25 }
 0x65d   :  { %1936 = vmatmul.mubr.bf16.vlgmr.msra.gmra.mrb[12].mxu1 %v1729_v26 }
 0x730   :  { %v1937_v30 = vpop.f32.mrb[12].mxu1 }
 0x731   :  { %v1938_v31 = vadd.f32 %v1937_v30, %v1736_v28  ;;  %v1939_v32 = vpop.f32.mrb[13].mxu1 }
 0x732   :  { %v1940_v33 = vadd.f32 %v1939_v32, %v1740_v29  ;;  %v1941_v34 = vpop.f32.mrb[14].mxu1 }
 0x733   :  { %v2210_v35 = vmul.f32 -1.442695, %v1938_v31  ;;  %v1942_v36 = vpop.f32.mrb[15].mxu1 }
 0x734   :  { %v2211_v37 = vmul.f32 -1.442695, %v1940_v33 }
 0x735   :  { %2575 = vpow2.f32 %v2210_v35 }
 0x736   :  { %2577 = vpow2.f32 %v2211_v37 }
 0x73f   :  { %v2576_v38 = vpop.eup %2575 }
 0x740   :  { %v2578_v39 = vpop.eup %2577  ;;  %v1950_v40 = vadd.f32 1.0, %v2576_v38 }
 0x741   :  { %v1951_v41 = vadd.f32 1.0, %v2578_v39 }
 0x742   :  { %2579 = vrcp.f32 %v1950_v40 }
 0x743   :  { %2581 = vrcp.f32 %v1951_v41 }
 0x74c   :  { %v2580_v42 = vpop.eup %2579 }
 0x74d   :  { %v2582_v14 = vpop.eup %2581  ;;  %1956 = vst [vmem:[%s3496_s18] sm:$0xff] %v2580_v42 }
 0x74e   :  { %1957 = vst [vmem:[%s3496_s18 + $0x8] sm:$0xff] %v2582_v14 }

</bundles_post_ra>
